<compile_context>
chip_gen: v6e
topology: v6e:2x2x1
jax: 0.10.0
libtpu: 0.0.40
codegen_flags: <defaults>
</compile_context>

<pallas_src>
import math

import jax
import jax.numpy as jnp
from jax.experimental import pallas as pl
from jax.experimental.pallas import tpu as pltpu

# ----------------------------- configuration --------------------------------
NODE_TYPES = ('flow', 'host')
EDGE_TYPES = (('flow', 'to', 'host'), ('host', 'rev_to', 'flow'))
HIDDEN = 32          # hidden_channels
OUT = 4              # out_channels
HEADS = 2            # num_heads
LAYERS = 2           # num_layers
D_HEAD = HIDDEN // HEADS
IN_DIMS = {'flow': 12, 'host': 6}
N_NODES = {'flow': 16, 'host': 8}
NT = len(NODE_TYPES)
ET = len(EDGE_TYPES)
LANES = 128

VMEM = pltpu.MemorySpace.VMEM

_SQRT1_2 = 0.7071067811865476

# exactly one incoming edge type per destination node type in this metadata
_INCOMING = []
for _ti, _dst in enumerate(NODE_TYPES):
    _m = [(i, e) for i, e in enumerate(EDGE_TYPES) if e[2] == _dst]
    assert len(_m) == 1
    _INCOMING.append(_m[0])


# ------------------------- packed parameter layout ---------------------------
def _build_layout():
    """Static row layout of the single (SLAB_ROWS, 128) parameter slab."""
    layout = {}
    row = 0

    def add(name, nrows):
        nonlocal row
        layout[name] = row
        row += ((nrows + 7) // 8) * 8          # 8-row (sublane) alignment

    add('lin_flow', IN_DIMS['flow'] + 1)       # weight rows + 1 bias row
    add('lin_host', IN_DIMS['host'] + 1)
    for idx in range(LAYERS * NT):             # fused kqv weight + bias row
        add(f'kqv{idx}', HIDDEN + 1)
    for idx in range(LAYERS * NT):             # [krel|vrel|a*out_w] + 2 rows
        add(f'dst{idx}', HIDDEN + 2)
    add('fin', HIDDEN + 1)                     # final head weight + bias row
    return layout, row


LAYOUT, SLAB_ROWS = _build_layout()


# ----------------------------- in-kernel helpers -----------------------------
def _gelu_exact(x):
    """Exact (erf-based) GELU matching F.gelu's default.

    erf via the Abramowitz & Stegun 7.1.26 polynomial (|err| <= 1.5e-7, i.e.
    float32-exact) -- only exp / mul / add / where, all plain VPU/EUP ops.
    """
    z = x * _SQRT1_2
    az = jnp.abs(z)
    t = 1.0 / (1.0 + 0.3275911 * az)
    poly = t * (0.254829592 + t * (-0.284496736 + t * (1.421413741
               + t * (-1.453152027 + t * 1.061405429))))
    erf_az = 1.0 - poly * jnp.exp(-az * az)
    erf_z = jnp.where(z < 0.0, -erf_az, erf_az)
    return 0.5 * x * (1.0 + erf_z)


# ----------------------------- fused forward kernel --------------------------
def _hgt_fused_kernel(xf_ref, xh_ref, adj0_ref, adj1_ref, w_ref, o_ref):
    f32 = jnp.float32

    # ---- input projections + ReLU (lin_dict) ----
    r = LAYOUT['lin_flow']
    hf = jnp.maximum(
        jnp.dot(xf_ref[...], w_ref[r:r + IN_DIMS['flow'], 0:HIDDEN],
                preferred_element_type=f32)
        + w_ref[r + IN_DIMS['flow']:r + IN_DIMS['flow'] + 1, 0:HIDDEN], 0.0)
    r = LAYOUT['lin_host']
    hh_ = jnp.maximum(
        jnp.dot(xh_ref[...], w_ref[r:r + IN_DIMS['host'], 0:HIDDEN],
                preferred_element_type=f32)
        + w_ref[r + IN_DIMS['host']:r + IN_DIMS['host'] + 1, 0:HIDDEN], 0.0)
    h = {'flow': hf, 'host': hh_}

    # dense 0/1 adjacency masks, mask[dst, src]
    masks = {EDGE_TYPES[0]: adj0_ref[...] > 0.0,
             EDGE_TYPES[1]: adj1_ref[...] > 0.0}

    # ---- HGTConv layers (static trace-time unroll) ----
    for l in range(LAYERS):
        # fused kqv projection: ONE (n, 96) matmul per node type, then slice
        kqv = {}
        for ti, t in enumerate(NODE_TYPES):
            idx = l * NT + ti
            r = LAYOUT[f'kqv{idx}']
            kqv[t] = (jnp.dot(h[t], w_ref[r:r + HIDDEN, 0:3 * HIDDEN],
                              preferred_element_type=f32)
                      + w_ref[r + HIDDEN:r + HIDDEN + 1, 0:3 * HIDDEN])

        new_h = {}
        for ti, dst in enumerate(NODE_TYPES):
            idx = l * NT + ti
            ei, et = _INCOMING[ti]
            src = et[0]
            r = LAYOUT[f'dst{idx}']

            k_src = kqv[src][:, 0:HIDDEN]
            q_all = kqv[dst][:, HIDDEN:2 * HIDDEN]
            v_src = kqv[src][:, 2 * HIDDEN:3 * HIDDEN]

            # full-width relation transforms hoisted out of the head loop
            # (p_rel and the 1/sqrt(D_HEAD) score scale are folded into krel)
            k_all = jnp.dot(k_src, w_ref[r:r + HIDDEN, 0:HIDDEN],
                            preferred_element_type=f32)
            v_all = jnp.dot(v_src, w_ref[r:r + HIDDEN, HIDDEN:2 * HIDDEN],
                            preferred_element_type=f32)
            mask = masks[et]                               # (n_dst, n_src)

            outs = []
            for hh in range(HEADS):                        # static unroll
                lo, hi = hh * D_HEAD, (hh + 1) * D_HEAD
                s = jax.lax.dot_general(q_all[:, lo:hi], k_all[:, lo:hi],
                                        (((1,), (1,)), ((), ())),
                                        preferred_element_type=f32)
                s = jnp.where(mask, s, -1e30)
                smax = jnp.max(s, axis=-1, keepdims=True)
                e = jnp.where(mask, jnp.exp(s - smax), 0.0)
                denom = jnp.sum(e, axis=-1, keepdims=True)
                alpha = e / jnp.maximum(denom, 1e-30)      # isolated dst -> 0
                outs.append(jnp.dot(alpha, v_all[:, lo:hi],
                                    preferred_element_type=f32))

            # single GELU + single out_lin matmul on the concatenated heads;
            # out_w/out_b are pre-scaled by a = sigmoid(skip) at init and the
            # slab stores a dedicated (1 - a) row for the skip mix.
            g = _gelu_exact(jnp.concatenate(outs, axis=-1))   # (n_dst, 32)
            y = (jnp.dot(g, w_ref[r:r + HIDDEN, 2 * HIDDEN:3 * HIDDEN],
                         preferred_element_type=f32)
                 + w_ref[r + HIDDEN:r + HIDDEN + 1, 0:HIDDEN])
            one_minus_a = w_ref[r + HIDDEN + 1:r + HIDDEN + 2, 0:HIDDEN]
            new_h[dst] = y + one_minus_a * h[dst]
        h = new_h

    # ---- output head: lin(x_dict['flow']) ----
    r = LAYOUT['fin']
    o_ref[...] = (jnp.dot(h['flow'], w_ref[r:r + HIDDEN, 0:OUT],
                          preferred_element_type=f32)
                  + w_ref[r + HIDDEN:r + HIDDEN + 1, 0:OUT]).astype(o_ref.dtype)


def hgt_forward(params, x_dict, adj_dict):
    """Single fused pallas_call for the whole HGT forward pass."""
    vspec = pl.BlockSpec(memory_space=VMEM)
    return pl.pallas_call(
        _hgt_fused_kernel,
        out_shape=jax.ShapeDtypeStruct((N_NODES['flow'], OUT), jnp.float32),
        in_specs=[vspec] * 5,
        out_specs=vspec,
    )(x_dict['flow'], x_dict['host'],
      adj_dict[EDGE_TYPES[0]], adj_dict[EDGE_TYPES[1]],
      params['slab'])


# ----------------------------- parameters ------------------------------------
def _glorot(key, shape):
    fan_in, fan_out = shape[-2], shape[-1]
    lim = math.sqrt(6.0 / (fan_in + fan_out))
    return jax.random.uniform(key, shape, jnp.float32, -lim, lim)


def _block_diag(blocks):
    """(H, D, D) per-head blocks -> (H*D, H*D) block-diagonal matrix."""
    H, D, _ = blocks.shape
    m = jnp.zeros((H * D, H * D), jnp.float32)
    for h in range(H):
        m = m.at[h * D:(h + 1) * D, h * D:(h + 1) * D].set(blocks[h])
    return m


def pack_slab(raw):
    """Fold constants and pack every parameter into one (SLAB_ROWS, 128) slab."""
    scale = 1.0 / math.sqrt(D_HEAD)            # power of two -> exact fold
    slab = jnp.zeros((SLAB_ROWS, LANES), jnp.float32)

    def put(s, row, col, arr):
        return s.at[row:row + arr.shape[0], col:col + arr.shape[1]].set(arr)

    for t in NODE_TYPES:
        r = LAYOUT[f'lin_{t}']
        slab = put(slab, r, 0, raw['lin_w'][t])
        slab = put(slab, r + IN_DIMS[t], 0, raw['lin_b'][t])

    for idx in range(LAYERS * NT):
        r = LAYOUT[f'kqv{idx}']
        slab = put(slab, r, 0, raw['kqv_w'][idx])
        slab = put(slab, r + HIDDEN, 0, raw['kqv_b'][idx])

    for l in range(LAYERS):
        for ti in range(NT):
            idx = l * NT + ti
            ei, _ = _INCOMING[ti]
            r = LAYOUT[f'dst{idx}']
            a = jax.nn.sigmoid(raw['skip'][idx])
            slab = put(slab, r, 0, raw['krel'][l * ET + ei] * scale)
            slab = put(slab, r, HIDDEN, raw['vrel'][l * ET + ei])
            slab = put(slab, r, 2 * HIDDEN, raw['out_w'][idx] * a)
            slab = put(slab, r + HIDDEN, 0, raw['out_b'][idx] * a)
            slab = put(slab, r + HIDDEN + 1, 0,
                       jnp.full((1, HIDDEN), 1.0, jnp.float32) * (1.0 - a))

    r = LAYOUT['fin']
    slab = put(slab, r, 0, raw['fin_w'])
    slab = put(slab, r + HIDDEN, 0, raw['fin_b'])
    return slab


def init_params(key):
    keys = iter(jax.random.split(key, 64))
    nk = lambda: next(keys)
    raw = {'lin_w': {}, 'lin_b': {}}
    for t in NODE_TYPES:
        raw['lin_w'][t] = _glorot(nk(), (IN_DIMS[t], HIDDEN))
        raw['lin_b'][t] = jnp.zeros((1, HIDDEN), jnp.float32)

    kqv_w, kqv_b, out_w, out_b, krel, vrel = [], [], [], [], [], []
    for _ in range(LAYERS):
        for _ in NODE_TYPES:
            kqv_w.append(_glorot(nk(), (HIDDEN, 3 * HIDDEN)))   # k|q|v fused
            kqv_b.append(jnp.zeros((1, 3 * HIDDEN), jnp.float32))
            out_w.append(_glorot(nk(), (HIDDEN, HIDDEN)))
            out_b.append(jnp.zeros((1, HIDDEN), jnp.float32))
        for _ in EDGE_TYPES:
            k_rel = _glorot(nk(), (HEADS, D_HEAD, D_HEAD))      # per-head (D,D)
            v_rel = _glorot(nk(), (HEADS, D_HEAD, D_HEAD))
            p_rel = jnp.ones((HEADS,), jnp.float32)             # PyG resets to 1
            krel.append(_block_diag(k_rel * p_rel[:, None, None]))
            vrel.append(_block_diag(v_rel))

    raw['kqv_w'] = jnp.stack(kqv_w)           # (LAYERS*NT, 32, 96)
    raw['kqv_b'] = jnp.stack(kqv_b)           # (LAYERS*NT, 1, 96)
    raw['out_w'] = jnp.stack(out_w)           # (LAYERS*NT, 32, 32)
    raw['out_b'] = jnp.stack(out_b)           # (LAYERS*NT, 1, 32)
    raw['krel'] = jnp.stack(krel)             # (LAYERS*ET, 32, 32)
    raw['vrel'] = jnp.stack(vrel)             # (LAYERS*ET, 32, 32)
    raw['skip'] = jnp.ones((LAYERS * NT,), jnp.float32)   # PyG resets to 1
    raw['fin_w'] = _glorot(nk(), (HIDDEN, OUT))
    raw['fin_b'] = jnp.zeros((1, OUT), jnp.float32)
    return {'raw': raw, 'slab': pack_slab(raw)}


# ----------------------------- pure-JAX reference ----------------------------
def hgt_reference(params, x_dict, adj_dict):
    """Plain-XLA reference with unfolded math, used to verify the kernel."""
    p = params['raw']
    h = {t: jax.nn.relu(x_dict[t] @ p['lin_w'][t] + p['lin_b'][t])
         for t in NODE_TYPES}
    for l in range(LAYERS):
        kqv = {}
        for ti, t in enumerate(NODE_TYPES):
            full = h[t] @ p['kqv_w'][l * NT + ti] + p['kqv_b'][l * NT + ti]
            kqv[t] = (full[:, :HIDDEN], full[:, HIDDEN:2 * HIDDEN],
                      full[:, 2 * HIDDEN:])
        new_h = {}
        for ti, dst in enumerate(NODE_TYPES):
            ei, et = _INCOMING[ti]
            src = et[0]
            k_e = kqv[src][0] @ p['krel'][l * ET + ei]
            v_e = kqv[src][2] @ p['vrel'][l * ET + ei]
            q = kqv[dst][1]
            mask = adj_dict[et] > 0.0
            outs = []
            for hh in range(HEADS):
                lo, hi = hh * D_HEAD, (hh + 1) * D_HEAD
                s = (q[:, lo:hi] @ k_e[:, lo:hi].T) / math.sqrt(D_HEAD)
                s = jnp.where(mask, s, -1e30)
                e = jnp.where(mask, jnp.exp(s - s.max(-1, keepdims=True)), 0.0)
                a = e / jnp.maximum(e.sum(-1, keepdims=True), 1e-30)
                outs.append(a @ v_e[:, lo:hi])
            g = jax.nn.gelu(jnp.concatenate(outs, axis=-1), approximate=False)
            y = g @ p['out_w'][l * NT + ti] + p['out_b'][l * NT + ti]
            a = jax.nn.sigmoid(p['skip'][l * NT + ti])
            new_h[dst] = a * y + (1.0 - a) * h[dst]
        h = new_h
    return h['flow'] @ p['fin_w'] + p['fin_b']


# ----------------------------- main -------------------------------------------
if __name__ == "__main__":
    key = jax.random.PRNGKey(0)
    kp, kx, ka = jax.random.split(key, 3)
    params = init_params(kp)

    x_dict = {}
    for t, k in zip(NODE_TYPES, jax.random.split(kx, len(NODE_TYPES))):
        x_dict[t] = jax.random.normal(k, (N_NODES[t], IN_DIMS[t]), jnp.float32)

    adj_dict = {}
    for et, k in zip(EDGE_TYPES, jax.random.split(ka, len(EDGE_TYPES))):
        adj_dict[et] = (jax.random.uniform(k, (N_NODES[et[2]], N_NODES[et[0]]))
                        < 0.35).astype(jnp.float32)

    out = hgt_forward(params, x_dict, adj_dict)
    out = jax.block_until_ready(out)
    assert out.shape == (N_NODES['flow'], OUT)
    assert bool(jnp.all(jnp.isfinite(out)))

    ref = hgt_reference(params, x_dict, adj_dict)
    assert bool(jnp.allclose(out, ref, rtol=1e-3, atol=1e-3)), \
        float(jnp.max(jnp.abs(out - ref)))

    print("KERNEL_OK")
</pallas_src>

<mosaic_0001>
module attributes {stable_mosaic.version = 11 : i64} {
  func.func @_hgt_fused_kernel(%arg0: memref<16x12xf32, #tpu.memory_space<vmem>>, %arg1: memref<8x6xf32, #tpu.memory_space<vmem>>, %arg2: memref<8x16xf32, #tpu.memory_space<vmem>>, %arg3: memref<16x8xf32, #tpu.memory_space<vmem>>, %arg4: memref<384x128xf32, #tpu.memory_space<vmem>>, %arg5: memref<16x4xf32, #tpu.memory_space<vmem>>) attributes {dimension_semantics = [], scalar_prefetch = 0 : i64, scratch_operands = 0 : i64, tpu.core_type = #tpu.core_type<tc>} {
    %c0 = arith.constant 0 : index
    %c0_0 = arith.constant 0 : index
    %0 = vector.load %arg0[%c0, %c0_0] : memref<16x12xf32, #tpu.memory_space<vmem>>, vector<16x12xf32>
    %c0_1 = arith.constant 0 : index
    %c0_2 = arith.constant 0 : index
    %1 = vector.load %arg4[%c0_1, %c0_2] : memref<384x128xf32, #tpu.memory_space<vmem>>, vector<12x32xf32>
    %cst = arith.constant dense<0.000000e+00> : vector<16x32xf32>
    %2 = tpu.matmul %0, %1, %cst {dimension_numbers = #tpu.dot_dimension_numbers<[1], [0], [0], [1], [0, 0, 1, 1], [], []>} : vector<16x12xf32>, vector<12x32xf32>, vector<16x32xf32> -> vector<16x32xf32>
    %c12 = arith.constant 12 : index
    %c0_3 = arith.constant 0 : index
    %3 = vector.load %arg4[%c12, %c0_3] : memref<384x128xf32, #tpu.memory_space<vmem>>, vector<1x32xf32>
    %4 = vector.broadcast %3 : vector<1x32xf32> to vector<16x32xf32>
    %5 = arith.addf %2, %4 : vector<16x32xf32>
    %cst_4 = arith.constant 0.000000e+00 : f32
    %6 = vector.broadcast %cst_4 : f32 to vector<16x32xf32>
    %7 = arith.maximumf %5, %6 : vector<16x32xf32>
    %c0_5 = arith.constant 0 : index
    %c0_6 = arith.constant 0 : index
    %8 = vector.load %arg1[%c0_5, %c0_6] : memref<8x6xf32, #tpu.memory_space<vmem>>, vector<8x6xf32>
    %c16 = arith.constant 16 : index
    %c0_7 = arith.constant 0 : index
    %9 = vector.load %arg4[%c16, %c0_7] : memref<384x128xf32, #tpu.memory_space<vmem>>, vector<6x32xf32>
    %cst_8 = arith.constant dense<0.000000e+00> : vector<8x32xf32>
    %10 = tpu.matmul %8, %9, %cst_8 {dimension_numbers = #tpu.dot_dimension_numbers<[1], [0], [0], [1], [0, 0, 1, 1], [], []>} : vector<8x6xf32>, vector<6x32xf32>, vector<8x32xf32> -> vector<8x32xf32>
    %c22 = arith.constant 22 : index
    %c0_9 = arith.constant 0 : index
    %11 = vector.load %arg4[%c22, %c0_9] : memref<384x128xf32, #tpu.memory_space<vmem>>, vector<1x32xf32>
    %12 = vector.broadcast %11 : vector<1x32xf32> to vector<8x32xf32>
    %13 = arith.addf %10, %12 : vector<8x32xf32>
    %cst_10 = arith.constant 0.000000e+00 : f32
    %14 = vector.broadcast %cst_10 : f32 to vector<8x32xf32>
    %15 = arith.maximumf %13, %14 : vector<8x32xf32>
    %c0_11 = arith.constant 0 : index
    %c0_12 = arith.constant 0 : index
    %16 = vector.load %arg2[%c0_11, %c0_12] : memref<8x16xf32, #tpu.memory_space<vmem>>, vector<8x16xf32>
    %cst_13 = arith.constant 0.000000e+00 : f32
    %17 = vector.broadcast %cst_13 : f32 to vector<8x16xf32>
    %18 = arith.cmpf ogt, %16, %17 : vector<8x16xf32>
    %c0_14 = arith.constant 0 : index
    %c0_15 = arith.constant 0 : index
    %19 = vector.load %arg3[%c0_14, %c0_15] : memref<16x8xf32, #tpu.memory_space<vmem>>, vector<16x8xf32>
    %cst_16 = arith.constant 0.000000e+00 : f32
    %20 = vector.broadcast %cst_16 : f32 to vector<16x8xf32>
    %21 = arith.cmpf ogt, %19, %20 : vector<16x8xf32>
    %c24 = arith.constant 24 : index
    %c0_17 = arith.constant 0 : index
    %22 = vector.load %arg4[%c24, %c0_17] : memref<384x128xf32, #tpu.memory_space<vmem>>, vector<32x96xf32>
    %cst_18 = arith.constant dense<0.000000e+00> : vector<16x96xf32>
    %23 = tpu.matmul %7, %22, %cst_18 {dimension_numbers = #tpu.dot_dimension_numbers<[1], [0], [0], [1], [0, 0, 1, 1], [], []>} : vector<16x32xf32>, vector<32x96xf32>, vector<16x96xf32> -> vector<16x96xf32>
    %c56 = arith.constant 56 : index
    %c0_19 = arith.constant 0 : index
    %24 = vector.load %arg4[%c56, %c0_19] : memref<384x128xf32, #tpu.memory_space<vmem>>, vector<1x96xf32>
    %25 = vector.broadcast %24 : vector<1x96xf32> to vector<16x96xf32>
    %26 = arith.addf %23, %25 : vector<16x96xf32>
    %c64 = arith.constant 64 : index
    %c0_20 = arith.constant 0 : index
    %27 = vector.load %arg4[%c64, %c0_20] : memref<384x128xf32, #tpu.memory_space<vmem>>, vector<32x96xf32>
    %cst_21 = arith.constant dense<0.000000e+00> : vector<8x96xf32>
    %28 = tpu.matmul %15, %27, %cst_21 {dimension_numbers = #tpu.dot_dimension_numbers<[1], [0], [0], [1], [0, 0, 1, 1], [], []>} : vector<8x32xf32>, vector<32x96xf32>, vector<8x96xf32> -> vector<8x96xf32>
    %c96 = arith.constant 96 : index
    %c0_22 = arith.constant 0 : index
    %29 = vector.load %arg4[%c96, %c0_22] : memref<384x128xf32, #tpu.memory_space<vmem>>, vector<1x96xf32>
    %30 = vector.broadcast %29 : vector<1x96xf32> to vector<8x96xf32>
    %31 = arith.addf %28, %30 : vector<8x96xf32>
    %32 = vector.extract_strided_slice %31 {offsets = [0, 0], sizes = [8, 32], strides = [1, 1]} : vector<8x96xf32> to vector<8x32xf32>
    %33 = vector.extract_strided_slice %26 {offsets = [0, 32], sizes = [16, 32], strides = [1, 1]} : vector<16x96xf32> to vector<16x32xf32>
    %34 = vector.extract_strided_slice %31 {offsets = [0, 64], sizes = [8, 32], strides = [1, 1]} : vector<8x96xf32> to vector<8x32xf32>
    %c184 = arith.constant 184 : index
    %c0_23 = arith.constant 0 : index
    %35 = vector.load %arg4[%c184, %c0_23] : memref<384x128xf32, #tpu.memory_space<vmem>>, vector<32x32xf32>
    %cst_24 = arith.constant dense<0.000000e+00> : vector<8x32xf32>
    %36 = tpu.matmul %32, %35, %cst_24 {dimension_numbers = #tpu.dot_dimension_numbers<[1], [0], [0], [1], [0, 0, 1, 1], [], []>} : vector<8x32xf32>, vector<32x32xf32>, vector<8x32xf32> -> vector<8x32xf32>
    %c184_25 = arith.constant 184 : index
    %c32 = arith.constant 32 : index
    %37 = vector.load %arg4[%c184_25, %c32] : memref<384x128xf32, #tpu.memory_space<vmem>>, vector<32x32xf32>
    %cst_26 = arith.constant dense<0.000000e+00> : vector<8x32xf32>
    %38 = tpu.matmul %34, %37, %cst_26 {dimension_numbers = #tpu.dot_dimension_numbers<[1], [0], [0], [1], [0, 0, 1, 1], [], []>} : vector<8x32xf32>, vector<32x32xf32>, vector<8x32xf32> -> vector<8x32xf32>
    %39 = vector.extract_strided_slice %33 {offsets = [0, 0], sizes = [16, 16], strides = [1, 1]} : vector<16x32xf32> to vector<16x16xf32>
    %40 = vector.extract_strided_slice %36 {offsets = [0, 0], sizes = [8, 16], strides = [1, 1]} : vector<8x32xf32> to vector<8x16xf32>
    %cst_27 = arith.constant dense<0.000000e+00> : vector<16x8xf32>
    %41 = tpu.matmul %39, %40, %cst_27 {dimension_numbers = #tpu.dot_dimension_numbers<[1], [1], [0], [0], [0, 0, 1, 0], [], []>} : vector<16x16xf32>, vector<8x16xf32>, vector<16x8xf32> -> vector<16x8xf32>
    %cst_28 = arith.constant -1.000000e+30 : f32
    %42 = vector.broadcast %cst_28 : f32 to vector<16x8xf32>
    %43 = arith.select %21, %41, %42 : vector<16x8xi1>, vector<16x8xf32>
    %cst_29 = arith.constant dense<0xFF800000> : vector<16xf32>
    %44 = vector.multi_reduction <maximumf>, %43, %cst_29 [1] : vector<16x8xf32> to vector<16xf32>
    %45 = vector.shape_cast %44 : vector<16xf32> to vector<16x1xf32>
    %46 = vector.broadcast %45 : vector<16x1xf32> to vector<16x8xf32>
    %47 = arith.subf %43, %46 : vector<16x8xf32>
    %48 = math.exp %47 : vector<16x8xf32>
    %cst_30 = arith.constant 0.000000e+00 : f32
    %49 = vector.broadcast %cst_30 : f32 to vector<16x8xf32>
    %50 = arith.select %21, %48, %49 : vector<16x8xi1>, vector<16x8xf32>
    %cst_31 = arith.constant dense<0.000000e+00> : vector<16xf32>
    %51 = vector.multi_reduction <add>, %50, %cst_31 [1] : vector<16x8xf32> to vector<16xf32>
    %52 = vector.shape_cast %51 : vector<16xf32> to vector<16x1xf32>
    %cst_32 = arith.constant 1.000000e-30 : f32
    %53 = vector.broadcast %cst_32 : f32 to vector<16x1xf32>
    %54 = arith.maximumf %52, %53 : vector<16x1xf32>
    %55 = vector.broadcast %54 : vector<16x1xf32> to vector<16x8xf32>
    %56 = arith.divf %50, %55 : vector<16x8xf32>
    %57 = vector.extract_strided_slice %38 {offsets = [0, 0], sizes = [8, 16], strides = [1, 1]} : vector<8x32xf32> to vector<8x16xf32>
    %cst_33 = arith.constant dense<0.000000e+00> : vector<16x16xf32>
    %58 = tpu.matmul %56, %57, %cst_33 {dimension_numbers = #tpu.dot_dimension_numbers<[1], [0], [0], [1], [0, 0, 1, 1], [], []>} : vector<16x8xf32>, vector<8x16xf32>, vector<16x16xf32> -> vector<16x16xf32>
    %59 = vector.extract_strided_slice %33 {offsets = [0, 16], sizes = [16, 16], strides = [1, 1]} : vector<16x32xf32> to vector<16x16xf32>
    %60 = vector.extract_strided_slice %36 {offsets = [0, 16], sizes = [8, 16], strides = [1, 1]} : vector<8x32xf32> to vector<8x16xf32>
    %cst_34 = arith.constant dense<0.000000e+00> : vector<16x8xf32>
    %61 = tpu.matmul %59, %60, %cst_34 {dimension_numbers = #tpu.dot_dimension_numbers<[1], [1], [0], [0], [0, 0, 1, 0], [], []>} : vector<16x16xf32>, vector<8x16xf32>, vector<16x8xf32> -> vector<16x8xf32>
    %cst_35 = arith.constant -1.000000e+30 : f32
    %62 = vector.broadcast %cst_35 : f32 to vector<16x8xf32>
    %63 = arith.select %21, %61, %62 : vector<16x8xi1>, vector<16x8xf32>
    %cst_36 = arith.constant dense<0xFF800000> : vector<16xf32>
    %64 = vector.multi_reduction <maximumf>, %63, %cst_36 [1] : vector<16x8xf32> to vector<16xf32>
    %65 = vector.shape_cast %64 : vector<16xf32> to vector<16x1xf32>
    %66 = vector.broadcast %65 : vector<16x1xf32> to vector<16x8xf32>
    %67 = arith.subf %63, %66 : vector<16x8xf32>
    %68 = math.exp %67 : vector<16x8xf32>
    %cst_37 = arith.constant 0.000000e+00 : f32
    %69 = vector.broadcast %cst_37 : f32 to vector<16x8xf32>
    %70 = arith.select %21, %68, %69 : vector<16x8xi1>, vector<16x8xf32>
    %cst_38 = arith.constant dense<0.000000e+00> : vector<16xf32>
    %71 = vector.multi_reduction <add>, %70, %cst_38 [1] : vector<16x8xf32> to vector<16xf32>
    %72 = vector.shape_cast %71 : vector<16xf32> to vector<16x1xf32>
    %cst_39 = arith.constant 1.000000e-30 : f32
    %73 = vector.broadcast %cst_39 : f32 to vector<16x1xf32>
    %74 = arith.maximumf %72, %73 : vector<16x1xf32>
    %75 = vector.broadcast %74 : vector<16x1xf32> to vector<16x8xf32>
    %76 = arith.divf %70, %75 : vector<16x8xf32>
    %77 = vector.extract_strided_slice %38 {offsets = [0, 16], sizes = [8, 16], strides = [1, 1]} : vector<8x32xf32> to vector<8x16xf32>
    %cst_40 = arith.constant dense<0.000000e+00> : vector<16x16xf32>
    %78 = tpu.matmul %76, %77, %cst_40 {dimension_numbers = #tpu.dot_dimension_numbers<[1], [0], [0], [1], [0, 0, 1, 1], [], []>} : vector<16x8xf32>, vector<8x16xf32>, vector<16x16xf32> -> vector<16x16xf32>
    %79 = tpu.concatenate %58, %78 in 1 : vector<16x16xf32>, vector<16x16xf32> -> vector<16x32xf32>
    %cst_41 = arith.constant 0.707106769 : f32
    %80 = vector.broadcast %cst_41 : f32 to vector<16x32xf32>
    %81 = arith.mulf %79, %80 : vector<16x32xf32>
    %82 = math.absf %81 : vector<16x32xf32>
    %cst_42 = arith.constant 0.327591091 : f32
    %83 = vector.broadcast %cst_42 : f32 to vector<16x32xf32>
    %84 = arith.mulf %83, %82 : vector<16x32xf32>
    %cst_43 = arith.constant 1.000000e+00 : f32
    %85 = vector.broadcast %cst_43 : f32 to vector<16x32xf32>
    %86 = arith.addf %85, %84 : vector<16x32xf32>
    %cst_44 = arith.constant 1.000000e+00 : f32
    %87 = vector.broadcast %cst_44 : f32 to vector<16x32xf32>
    %88 = arith.divf %87, %86 : vector<16x32xf32>
    %cst_45 = arith.constant 1.06140542 : f32
    %89 = vector.broadcast %cst_45 : f32 to vector<16x32xf32>
    %90 = arith.mulf %88, %89 : vector<16x32xf32>
    %cst_46 = arith.constant -1.45315206 : f32
    %91 = vector.broadcast %cst_46 : f32 to vector<16x32xf32>
    %92 = arith.addf %91, %90 : vector<16x32xf32>
    %93 = arith.mulf %88, %92 : vector<16x32xf32>
    %cst_47 = arith.constant 1.42141378 : f32
    %94 = vector.broadcast %cst_47 : f32 to vector<16x32xf32>
    %95 = arith.addf %94, %93 : vector<16x32xf32>
    %96 = arith.mulf %88, %95 : vector<16x32xf32>
    %cst_48 = arith.constant -0.284496725 : f32
    %97 = vector.broadcast %cst_48 : f32 to vector<16x32xf32>
    %98 = arith.addf %97, %96 : vector<16x32xf32>
    %99 = arith.mulf %88, %98 : vector<16x32xf32>
    %cst_49 = arith.constant 0.254829586 : f32
    %100 = vector.broadcast %cst_49 : f32 to vector<16x32xf32>
    %101 = arith.addf %100, %99 : vector<16x32xf32>
    %102 = arith.mulf %88, %101 : vector<16x32xf32>
    %cst_50 = arith.constant 0.000000e+00 : f32
    %103 = vector.broadcast %cst_50 : f32 to vector<16x32xf32>
    %104 = arith.subf %103, %82 : vector<16x32xf32>
    %105 = arith.mulf %104, %82 : vector<16x32xf32>
    %106 = math.exp %105 : vector<16x32xf32>
    %107 = arith.mulf %102, %106 : vector<16x32xf32>
    %cst_51 = arith.constant 1.000000e+00 : f32
    %108 = vector.broadcast %cst_51 : f32 to vector<16x32xf32>
    %109 = arith.subf %108, %107 : vector<16x32xf32>
    %cst_52 = arith.constant 0.000000e+00 : f32
    %110 = vector.broadcast %cst_52 : f32 to vector<16x32xf32>
    %111 = arith.cmpf olt, %81, %110 : vector<16x32xf32>
    %cst_53 = arith.constant 0.000000e+00 : f32
    %112 = vector.broadcast %cst_53 : f32 to vector<16x32xf32>
    %113 = arith.subf %112, %109 : vector<16x32xf32>
    %114 = arith.select %111, %113, %109 : vector<16x32xi1>, vector<16x32xf32>
    %cst_54 = arith.constant 5.000000e-01 : f32
    %115 = vector.broadcast %cst_54 : f32 to vector<16x32xf32>
    %116 = arith.mulf %115, %79 : vector<16x32xf32>
    %cst_55 = arith.constant 1.000000e+00 : f32
    %117 = vector.broadcast %cst_55 : f32 to vector<16x32xf32>
    %118 = arith.addf %117, %114 : vector<16x32xf32>
    %119 = arith.mulf %116, %118 : vector<16x32xf32>
    %c184_56 = arith.constant 184 : index
    %c64_57 = arith.constant 64 : index
    %120 = vector.load %arg4[%c184_56, %c64_57] : memref<384x128xf32, #tpu.memory_space<vmem>>, vector<32x32xf32>
    %cst_58 = arith.constant dense<0.000000e+00> : vector<16x32xf32>
    %121 = tpu.matmul %119, %120, %cst_58 {dimension_numbers = #tpu.dot_dimension_numbers<[1], [0], [0], [1], [0, 0, 1, 1], [], []>} : vector<16x32xf32>, vector<32x32xf32>, vector<16x32xf32> -> vector<16x32xf32>
    %c216 = arith.constant 216 : index
    %c0_59 = arith.constant 0 : index
    %122 = vector.load %arg4[%c216, %c0_59] : memref<384x128xf32, #tpu.memory_space<vmem>>, vector<1x32xf32>
    %123 = vector.broadcast %122 : vector<1x32xf32> to vector<16x32xf32>
    %124 = arith.addf %121, %123 : vector<16x32xf32>
    %c217 = arith.constant 217 : index
    %c0_60 = arith.constant 0 : index
    %125 = vector.load %arg4[%c217, %c0_60] : memref<384x128xf32, #tpu.memory_space<vmem>>, vector<1x32xf32>
    %126 = vector.broadcast %125 : vector<1x32xf32> to vector<16x32xf32>
    %127 = arith.mulf %126, %7 : vector<16x32xf32>
    %128 = arith.addf %124, %127 : vector<16x32xf32>
    %129 = vector.extract_strided_slice %26 {offsets = [0, 0], sizes = [16, 32], strides = [1, 1]} : vector<16x96xf32> to vector<16x32xf32>
    %130 = vector.extract_strided_slice %31 {offsets = [0, 32], sizes = [8, 32], strides = [1, 1]} : vector<8x96xf32> to vector<8x32xf32>
    %131 = vector.extract_strided_slice %26 {offsets = [0, 64], sizes = [16, 32], strides = [1, 1]} : vector<16x96xf32> to vector<16x32xf32>
    %c224 = arith.constant 224 : index
    %c0_61 = arith.constant 0 : index
    %132 = vector.load %arg4[%c224, %c0_61] : memref<384x128xf32, #tpu.memory_space<vmem>>, vector<32x32xf32>
    %cst_62 = arith.constant dense<0.000000e+00> : vector<16x32xf32>
    %133 = tpu.matmul %129, %132, %cst_62 {dimension_numbers = #tpu.dot_dimension_numbers<[1], [0], [0], [1], [0, 0, 1, 1], [], []>} : vector<16x32xf32>, vector<32x32xf32>, vector<16x32xf32> -> vector<16x32xf32>
    %c224_63 = arith.constant 224 : index
    %c32_64 = arith.constant 32 : index
    %134 = vector.load %arg4[%c224_63, %c32_64] : memref<384x128xf32, #tpu.memory_space<vmem>>, vector<32x32xf32>
    %cst_65 = arith.constant dense<0.000000e+00> : vector<16x32xf32>
    %135 = tpu.matmul %131, %134, %cst_65 {dimension_numbers = #tpu.dot_dimension_numbers<[1], [0], [0], [1], [0, 0, 1, 1], [], []>} : vector<16x32xf32>, vector<32x32xf32>, vector<16x32xf32> -> vector<16x32xf32>
    %136 = vector.extract_strided_slice %130 {offsets = [0, 0], sizes = [8, 16], strides = [1, 1]} : vector<8x32xf32> to vector<8x16xf32>
    %137 = vector.extract_strided_slice %133 {offsets = [0, 0], sizes = [16, 16], strides = [1, 1]} : vector<16x32xf32> to vector<16x16xf32>
    %cst_66 = arith.constant dense<0.000000e+00> : vector<8x16xf32>
    %138 = tpu.matmul %136, %137, %cst_66 {dimension_numbers = #tpu.dot_dimension_numbers<[1], [1], [0], [0], [0, 0, 1, 0], [], []>} : vector<8x16xf32>, vector<16x16xf32>, vector<8x16xf32> -> vector<8x16xf32>
    %cst_67 = arith.constant -1.000000e+30 : f32
    %139 = vector.broadcast %cst_67 : f32 to vector<8x16xf32>
    %140 = arith.select %18, %138, %139 : vector<8x16xi1>, vector<8x16xf32>
    %cst_68 = arith.constant dense<0xFF800000> : vector<8xf32>
    %141 = vector.multi_reduction <maximumf>, %140, %cst_68 [1] : vector<8x16xf32> to vector<8xf32>
    %142 = vector.shape_cast %141 : vector<8xf32> to vector<8x1xf32>
    %143 = vector.broadcast %142 : vector<8x1xf32> to vector<8x16xf32>
    %144 = arith.subf %140, %143 : vector<8x16xf32>
    %145 = math.exp %144 : vector<8x16xf32>
    %cst_69 = arith.constant 0.000000e+00 : f32
    %146 = vector.broadcast %cst_69 : f32 to vector<8x16xf32>
    %147 = arith.select %18, %145, %146 : vector<8x16xi1>, vector<8x16xf32>
    %cst_70 = arith.constant dense<0.000000e+00> : vector<8xf32>
    %148 = vector.multi_reduction <add>, %147, %cst_70 [1] : vector<8x16xf32> to vector<8xf32>
    %149 = vector.shape_cast %148 : vector<8xf32> to vector<8x1xf32>
    %cst_71 = arith.constant 1.000000e-30 : f32
    %150 = vector.broadcast %cst_71 : f32 to vector<8x1xf32>
    %151 = arith.maximumf %149, %150 : vector<8x1xf32>
    %152 = vector.broadcast %151 : vector<8x1xf32> to vector<8x16xf32>
    %153 = arith.divf %147, %152 : vector<8x16xf32>
    %154 = vector.extract_strided_slice %135 {offsets = [0, 0], sizes = [16, 16], strides = [1, 1]} : vector<16x32xf32> to vector<16x16xf32>
    %cst_72 = arith.constant dense<0.000000e+00> : vector<8x16xf32>
    %155 = tpu.matmul %153, %154, %cst_72 {dimension_numbers = #tpu.dot_dimension_numbers<[1], [0], [0], [1], [0, 0, 1, 1], [], []>} : vector<8x16xf32>, vector<16x16xf32>, vector<8x16xf32> -> vector<8x16xf32>
    %156 = vector.extract_strided_slice %130 {offsets = [0, 16], sizes = [8, 16], strides = [1, 1]} : vector<8x32xf32> to vector<8x16xf32>
    %157 = vector.extract_strided_slice %133 {offsets = [0, 16], sizes = [16, 16], strides = [1, 1]} : vector<16x32xf32> to vector<16x16xf32>
    %cst_73 = arith.constant dense<0.000000e+00> : vector<8x16xf32>
    %158 = tpu.matmul %156, %157, %cst_73 {dimension_numbers = #tpu.dot_dimension_numbers<[1], [1], [0], [0], [0, 0, 1, 0], [], []>} : vector<8x16xf32>, vector<16x16xf32>, vector<8x16xf32> -> vector<8x16xf32>
    %cst_74 = arith.constant -1.000000e+30 : f32
    %159 = vector.broadcast %cst_74 : f32 to vector<8x16xf32>
    %160 = arith.select %18, %158, %159 : vector<8x16xi1>, vector<8x16xf32>
    %cst_75 = arith.constant dense<0xFF800000> : vector<8xf32>
    %161 = vector.multi_reduction <maximumf>, %160, %cst_75 [1] : vector<8x16xf32> to vector<8xf32>
    %162 = vector.shape_cast %161 : vector<8xf32> to vector<8x1xf32>
    %163 = vector.broadcast %162 : vector<8x1xf32> to vector<8x16xf32>
    %164 = arith.subf %160, %163 : vector<8x16xf32>
    %165 = math.exp %164 : vector<8x16xf32>
    %cst_76 = arith.constant 0.000000e+00 : f32
    %166 = vector.broadcast %cst_76 : f32 to vector<8x16xf32>
    %167 = arith.select %18, %165, %166 : vector<8x16xi1>, vector<8x16xf32>
    %cst_77 = arith.constant dense<0.000000e+00> : vector<8xf32>
    %168 = vector.multi_reduction <add>, %167, %cst_77 [1] : vector<8x16xf32> to vector<8xf32>
    %169 = vector.shape_cast %168 : vector<8xf32> to vector<8x1xf32>
    %cst_78 = arith.constant 1.000000e-30 : f32
    %170 = vector.broadcast %cst_78 : f32 to vector<8x1xf32>
    %171 = arith.maximumf %169, %170 : vector<8x1xf32>
    %172 = vector.broadcast %171 : vector<8x1xf32> to vector<8x16xf32>
    %173 = arith.divf %167, %172 : vector<8x16xf32>
    %174 = vector.extract_strided_slice %135 {offsets = [0, 16], sizes = [16, 16], strides = [1, 1]} : vector<16x32xf32> to vector<16x16xf32>
    %cst_79 = arith.constant dense<0.000000e+00> : vector<8x16xf32>
    %175 = tpu.matmul %173, %174, %cst_79 {dimension_numbers = #tpu.dot_dimension_numbers<[1], [0], [0], [1], [0, 0, 1, 1], [], []>} : vector<8x16xf32>, vector<16x16xf32>, vector<8x16xf32> -> vector<8x16xf32>
    %176 = tpu.concatenate %155, %175 in 1 : vector<8x16xf32>, vector<8x16xf32> -> vector<8x32xf32>
    %cst_80 = arith.constant 0.707106769 : f32
    %177 = vector.broadcast %cst_80 : f32 to vector<8x32xf32>
    %178 = arith.mulf %176, %177 : vector<8x32xf32>
    %179 = math.absf %178 : vector<8x32xf32>
    %cst_81 = arith.constant 0.327591091 : f32
    %180 = vector.broadcast %cst_81 : f32 to vector<8x32xf32>
    %181 = arith.mulf %180, %179 : vector<8x32xf32>
    %cst_82 = arith.constant 1.000000e+00 : f32
    %182 = vector.broadcast %cst_82 : f32 to vector<8x32xf32>
    %183 = arith.addf %182, %181 : vector<8x32xf32>
    %cst_83 = arith.constant 1.000000e+00 : f32
    %184 = vector.broadcast %cst_83 : f32 to vector<8x32xf32>
    %185 = arith.divf %184, %183 : vector<8x32xf32>
    %cst_84 = arith.constant 1.06140542 : f32
    %186 = vector.broadcast %cst_84 : f32 to vector<8x32xf32>
    %187 = arith.mulf %185, %186 : vector<8x32xf32>
    %cst_85 = arith.constant -1.45315206 : f32
    %188 = vector.broadcast %cst_85 : f32 to vector<8x32xf32>
    %189 = arith.addf %188, %187 : vector<8x32xf32>
    %190 = arith.mulf %185, %189 : vector<8x32xf32>
    %cst_86 = arith.constant 1.42141378 : f32
    %191 = vector.broadcast %cst_86 : f32 to vector<8x32xf32>
    %192 = arith.addf %191, %190 : vector<8x32xf32>
    %193 = arith.mulf %185, %192 : vector<8x32xf32>
    %cst_87 = arith.constant -0.284496725 : f32
    %194 = vector.broadcast %cst_87 : f32 to vector<8x32xf32>
    %195 = arith.addf %194, %193 : vector<8x32xf32>
    %196 = arith.mulf %185, %195 : vector<8x32xf32>
    %cst_88 = arith.constant 0.254829586 : f32
    %197 = vector.broadcast %cst_88 : f32 to vector<8x32xf32>
    %198 = arith.addf %197, %196 : vector<8x32xf32>
    %199 = arith.mulf %185, %198 : vector<8x32xf32>
    %cst_89 = arith.constant 0.000000e+00 : f32
    %200 = vector.broadcast %cst_89 : f32 to vector<8x32xf32>
    %201 = arith.subf %200, %179 : vector<8x32xf32>
    %202 = arith.mulf %201, %179 : vector<8x32xf32>
    %203 = math.exp %202 : vector<8x32xf32>
    %204 = arith.mulf %199, %203 : vector<8x32xf32>
    %cst_90 = arith.constant 1.000000e+00 : f32
    %205 = vector.broadcast %cst_90 : f32 to vector<8x32xf32>
    %206 = arith.subf %205, %204 : vector<8x32xf32>
    %cst_91 = arith.constant 0.000000e+00 : f32
    %207 = vector.broadcast %cst_91 : f32 to vector<8x32xf32>
    %208 = arith.cmpf olt, %178, %207 : vector<8x32xf32>
    %cst_92 = arith.constant 0.000000e+00 : f32
    %209 = vector.broadcast %cst_92 : f32 to vector<8x32xf32>
    %210 = arith.subf %209, %206 : vector<8x32xf32>
    %211 = arith.select %208, %210, %206 : vector<8x32xi1>, vector<8x32xf32>
    %cst_93 = arith.constant 5.000000e-01 : f32
    %212 = vector.broadcast %cst_93 : f32 to vector<8x32xf32>
    %213 = arith.mulf %212, %176 : vector<8x32xf32>
    %cst_94 = arith.constant 1.000000e+00 : f32
    %214 = vector.broadcast %cst_94 : f32 to vector<8x32xf32>
    %215 = arith.addf %214, %211 : vector<8x32xf32>
    %216 = arith.mulf %213, %215 : vector<8x32xf32>
    %c224_95 = arith.constant 224 : index
    %c64_96 = arith.constant 64 : index
    %217 = vector.load %arg4[%c224_95, %c64_96] : memref<384x128xf32, #tpu.memory_space<vmem>>, vector<32x32xf32>
    %cst_97 = arith.constant dense<0.000000e+00> : vector<8x32xf32>
    %218 = tpu.matmul %216, %217, %cst_97 {dimension_numbers = #tpu.dot_dimension_numbers<[1], [0], [0], [1], [0, 0, 1, 1], [], []>} : vector<8x32xf32>, vector<32x32xf32>, vector<8x32xf32> -> vector<8x32xf32>
    %c256 = arith.constant 256 : index
    %c0_98 = arith.constant 0 : index
    %219 = vector.load %arg4[%c256, %c0_98] : memref<384x128xf32, #tpu.memory_space<vmem>>, vector<1x32xf32>
    %220 = vector.broadcast %219 : vector<1x32xf32> to vector<8x32xf32>
    %221 = arith.addf %218, %220 : vector<8x32xf32>
    %c257 = arith.constant 257 : index
    %c0_99 = arith.constant 0 : index
    %222 = vector.load %arg4[%c257, %c0_99] : memref<384x128xf32, #tpu.memory_space<vmem>>, vector<1x32xf32>
    %223 = vector.broadcast %222 : vector<1x32xf32> to vector<8x32xf32>
    %224 = arith.mulf %223, %15 : vector<8x32xf32>
    %225 = arith.addf %221, %224 : vector<8x32xf32>
    %c104 = arith.constant 104 : index
    %c0_100 = arith.constant 0 : index
    %226 = vector.load %arg4[%c104, %c0_100] : memref<384x128xf32, #tpu.memory_space<vmem>>, vector<32x96xf32>
    %cst_101 = arith.constant dense<0.000000e+00> : vector<16x96xf32>
    %227 = tpu.matmul %128, %226, %cst_101 {dimension_numbers = #tpu.dot_dimension_numbers<[1], [0], [0], [1], [0, 0, 1, 1], [], []>} : vector<16x32xf32>, vector<32x96xf32>, vector<16x96xf32> -> vector<16x96xf32>
    %c136 = arith.constant 136 : index
    %c0_102 = arith.constant 0 : index
    %228 = vector.load %arg4[%c136, %c0_102] : memref<384x128xf32, #tpu.memory_space<vmem>>, vector<1x96xf32>
    %229 = vector.broadcast %228 : vector<1x96xf32> to vector<16x96xf32>
    %230 = arith.addf %227, %229 : vector<16x96xf32>
    %c144 = arith.constant 144 : index
    %c0_103 = arith.constant 0 : index
    %231 = vector.load %arg4[%c144, %c0_103] : memref<384x128xf32, #tpu.memory_space<vmem>>, vector<32x96xf32>
    %cst_104 = arith.constant dense<0.000000e+00> : vector<8x96xf32>
    %232 = tpu.matmul %225, %231, %cst_104 {dimension_numbers = #tpu.dot_dimension_numbers<[1], [0], [0], [1], [0, 0, 1, 1], [], []>} : vector<8x32xf32>, vector<32x96xf32>, vector<8x96xf32> -> vector<8x96xf32>
    %c176 = arith.constant 176 : index
    %c0_105 = arith.constant 0 : index
    %233 = vector.load %arg4[%c176, %c0_105] : memref<384x128xf32, #tpu.memory_space<vmem>>, vector<1x96xf32>
    %234 = vector.broadcast %233 : vector<1x96xf32> to vector<8x96xf32>
    %235 = arith.addf %232, %234 : vector<8x96xf32>
    %236 = vector.extract_strided_slice %235 {offsets = [0, 0], sizes = [8, 32], strides = [1, 1]} : vector<8x96xf32> to vector<8x32xf32>
    %237 = vector.extract_strided_slice %230 {offsets = [0, 32], sizes = [16, 32], strides = [1, 1]} : vector<16x96xf32> to vector<16x32xf32>
    %238 = vector.extract_strided_slice %235 {offsets = [0, 64], sizes = [8, 32], strides = [1, 1]} : vector<8x96xf32> to vector<8x32xf32>
    %c264 = arith.constant 264 : index
    %c0_106 = arith.constant 0 : index
    %239 = vector.load %arg4[%c264, %c0_106] : memref<384x128xf32, #tpu.memory_space<vmem>>, vector<32x32xf32>
    %cst_107 = arith.constant dense<0.000000e+00> : vector<8x32xf32>
    %240 = tpu.matmul %236, %239, %cst_107 {dimension_numbers = #tpu.dot_dimension_numbers<[1], [0], [0], [1], [0, 0, 1, 1], [], []>} : vector<8x32xf32>, vector<32x32xf32>, vector<8x32xf32> -> vector<8x32xf32>
    %c264_108 = arith.constant 264 : index
    %c32_109 = arith.constant 32 : index
    %241 = vector.load %arg4[%c264_108, %c32_109] : memref<384x128xf32, #tpu.memory_space<vmem>>, vector<32x32xf32>
    %cst_110 = arith.constant dense<0.000000e+00> : vector<8x32xf32>
    %242 = tpu.matmul %238, %241, %cst_110 {dimension_numbers = #tpu.dot_dimension_numbers<[1], [0], [0], [1], [0, 0, 1, 1], [], []>} : vector<8x32xf32>, vector<32x32xf32>, vector<8x32xf32> -> vector<8x32xf32>
    %243 = vector.extract_strided_slice %237 {offsets = [0, 0], sizes = [16, 16], strides = [1, 1]} : vector<16x32xf32> to vector<16x16xf32>
    %244 = vector.extract_strided_slice %240 {offsets = [0, 0], sizes = [8, 16], strides = [1, 1]} : vector<8x32xf32> to vector<8x16xf32>
    %cst_111 = arith.constant dense<0.000000e+00> : vector<16x8xf32>
    %245 = tpu.matmul %243, %244, %cst_111 {dimension_numbers = #tpu.dot_dimension_numbers<[1], [1], [0], [0], [0, 0, 1, 0], [], []>} : vector<16x16xf32>, vector<8x16xf32>, vector<16x8xf32> -> vector<16x8xf32>
    %cst_112 = arith.constant -1.000000e+30 : f32
    %246 = vector.broadcast %cst_112 : f32 to vector<16x8xf32>
    %247 = arith.select %21, %245, %246 : vector<16x8xi1>, vector<16x8xf32>
    %cst_113 = arith.constant dense<0xFF800000> : vector<16xf32>
    %248 = vector.multi_reduction <maximumf>, %247, %cst_113 [1] : vector<16x8xf32> to vector<16xf32>
    %249 = vector.shape_cast %248 : vector<16xf32> to vector<16x1xf32>
    %250 = vector.broadcast %249 : vector<16x1xf32> to vector<16x8xf32>
    %251 = arith.subf %247, %250 : vector<16x8xf32>
    %252 = math.exp %251 : vector<16x8xf32>
    %cst_114 = arith.constant 0.000000e+00 : f32
    %253 = vector.broadcast %cst_114 : f32 to vector<16x8xf32>
    %254 = arith.select %21, %252, %253 : vector<16x8xi1>, vector<16x8xf32>
    %cst_115 = arith.constant dense<0.000000e+00> : vector<16xf32>
    %255 = vector.multi_reduction <add>, %254, %cst_115 [1] : vector<16x8xf32> to vector<16xf32>
    %256 = vector.shape_cast %255 : vector<16xf32> to vector<16x1xf32>
    %cst_116 = arith.constant 1.000000e-30 : f32
    %257 = vector.broadcast %cst_116 : f32 to vector<16x1xf32>
    %258 = arith.maximumf %256, %257 : vector<16x1xf32>
    %259 = vector.broadcast %258 : vector<16x1xf32> to vector<16x8xf32>
    %260 = arith.divf %254, %259 : vector<16x8xf32>
    %261 = vector.extract_strided_slice %242 {offsets = [0, 0], sizes = [8, 16], strides = [1, 1]} : vector<8x32xf32> to vector<8x16xf32>
    %cst_117 = arith.constant dense<0.000000e+00> : vector<16x16xf32>
    %262 = tpu.matmul %260, %261, %cst_117 {dimension_numbers = #tpu.dot_dimension_numbers<[1], [0], [0], [1], [0, 0, 1, 1], [], []>} : vector<16x8xf32>, vector<8x16xf32>, vector<16x16xf32> -> vector<16x16xf32>
    %263 = vector.extract_strided_slice %237 {offsets = [0, 16], sizes = [16, 16], strides = [1, 1]} : vector<16x32xf32> to vector<16x16xf32>
    %264 = vector.extract_strided_slice %240 {offsets = [0, 16], sizes = [8, 16], strides = [1, 1]} : vector<8x32xf32> to vector<8x16xf32>
    %cst_118 = arith.constant dense<0.000000e+00> : vector<16x8xf32>
    %265 = tpu.matmul %263, %264, %cst_118 {dimension_numbers = #tpu.dot_dimension_numbers<[1], [1], [0], [0], [0, 0, 1, 0], [], []>} : vector<16x16xf32>, vector<8x16xf32>, vector<16x8xf32> -> vector<16x8xf32>
    %cst_119 = arith.constant -1.000000e+30 : f32
    %266 = vector.broadcast %cst_119 : f32 to vector<16x8xf32>
    %267 = arith.select %21, %265, %266 : vector<16x8xi1>, vector<16x8xf32>
    %cst_120 = arith.constant dense<0xFF800000> : vector<16xf32>
    %268 = vector.multi_reduction <maximumf>, %267, %cst_120 [1] : vector<16x8xf32> to vector<16xf32>
    %269 = vector.shape_cast %268 : vector<16xf32> to vector<16x1xf32>
    %270 = vector.broadcast %269 : vector<16x1xf32> to vector<16x8xf32>
    %271 = arith.subf %267, %270 : vector<16x8xf32>
    %272 = math.exp %271 : vector<16x8xf32>
    %cst_121 = arith.constant 0.000000e+00 : f32
    %273 = vector.broadcast %cst_121 : f32 to vector<16x8xf32>
    %274 = arith.select %21, %272, %273 : vector<16x8xi1>, vector<16x8xf32>
    %cst_122 = arith.constant dense<0.000000e+00> : vector<16xf32>
    %275 = vector.multi_reduction <add>, %274, %cst_122 [1] : vector<16x8xf32> to vector<16xf32>
    %276 = vector.shape_cast %275 : vector<16xf32> to vector<16x1xf32>
    %cst_123 = arith.constant 1.000000e-30 : f32
    %277 = vector.broadcast %cst_123 : f32 to vector<16x1xf32>
    %278 = arith.maximumf %276, %277 : vector<16x1xf32>
    %279 = vector.broadcast %278 : vector<16x1xf32> to vector<16x8xf32>
    %280 = arith.divf %274, %279 : vector<16x8xf32>
    %281 = vector.extract_strided_slice %242 {offsets = [0, 16], sizes = [8, 16], strides = [1, 1]} : vector<8x32xf32> to vector<8x16xf32>
    %cst_124 = arith.constant dense<0.000000e+00> : vector<16x16xf32>
    %282 = tpu.matmul %280, %281, %cst_124 {dimension_numbers = #tpu.dot_dimension_numbers<[1], [0], [0], [1], [0, 0, 1, 1], [], []>} : vector<16x8xf32>, vector<8x16xf32>, vector<16x16xf32> -> vector<16x16xf32>
    %283 = tpu.concatenate %262, %282 in 1 : vector<16x16xf32>, vector<16x16xf32> -> vector<16x32xf32>
    %cst_125 = arith.constant 0.707106769 : f32
    %284 = vector.broadcast %cst_125 : f32 to vector<16x32xf32>
    %285 = arith.mulf %283, %284 : vector<16x32xf32>
    %286 = math.absf %285 : vector<16x32xf32>
    %cst_126 = arith.constant 0.327591091 : f32
    %287 = vector.broadcast %cst_126 : f32 to vector<16x32xf32>
    %288 = arith.mulf %287, %286 : vector<16x32xf32>
    %cst_127 = arith.constant 1.000000e+00 : f32
    %289 = vector.broadcast %cst_127 : f32 to vector<16x32xf32>
    %290 = arith.addf %289, %288 : vector<16x32xf32>
    %cst_128 = arith.constant 1.000000e+00 : f32
    %291 = vector.broadcast %cst_128 : f32 to vector<16x32xf32>
    %292 = arith.divf %291, %290 : vector<16x32xf32>
    %cst_129 = arith.constant 1.06140542 : f32
    %293 = vector.broadcast %cst_129 : f32 to vector<16x32xf32>
    %294 = arith.mulf %292, %293 : vector<16x32xf32>
    %cst_130 = arith.constant -1.45315206 : f32
    %295 = vector.broadcast %cst_130 : f32 to vector<16x32xf32>
    %296 = arith.addf %295, %294 : vector<16x32xf32>
    %297 = arith.mulf %292, %296 : vector<16x32xf32>
    %cst_131 = arith.constant 1.42141378 : f32
    %298 = vector.broadcast %cst_131 : f32 to vector<16x32xf32>
    %299 = arith.addf %298, %297 : vector<16x32xf32>
    %300 = arith.mulf %292, %299 : vector<16x32xf32>
    %cst_132 = arith.constant -0.284496725 : f32
    %301 = vector.broadcast %cst_132 : f32 to vector<16x32xf32>
    %302 = arith.addf %301, %300 : vector<16x32xf32>
    %303 = arith.mulf %292, %302 : vector<16x32xf32>
    %cst_133 = arith.constant 0.254829586 : f32
    %304 = vector.broadcast %cst_133 : f32 to vector<16x32xf32>
    %305 = arith.addf %304, %303 : vector<16x32xf32>
    %306 = arith.mulf %292, %305 : vector<16x32xf32>
    %cst_134 = arith.constant 0.000000e+00 : f32
    %307 = vector.broadcast %cst_134 : f32 to vector<16x32xf32>
    %308 = arith.subf %307, %286 : vector<16x32xf32>
    %309 = arith.mulf %308, %286 : vector<16x32xf32>
    %310 = math.exp %309 : vector<16x32xf32>
    %311 = arith.mulf %306, %310 : vector<16x32xf32>
    %cst_135 = arith.constant 1.000000e+00 : f32
    %312 = vector.broadcast %cst_135 : f32 to vector<16x32xf32>
    %313 = arith.subf %312, %311 : vector<16x32xf32>
    %cst_136 = arith.constant 0.000000e+00 : f32
    %314 = vector.broadcast %cst_136 : f32 to vector<16x32xf32>
    %315 = arith.cmpf olt, %285, %314 : vector<16x32xf32>
    %cst_137 = arith.constant 0.000000e+00 : f32
    %316 = vector.broadcast %cst_137 : f32 to vector<16x32xf32>
    %317 = arith.subf %316, %313 : vector<16x32xf32>
    %318 = arith.select %315, %317, %313 : vector<16x32xi1>, vector<16x32xf32>
    %cst_138 = arith.constant 5.000000e-01 : f32
    %319 = vector.broadcast %cst_138 : f32 to vector<16x32xf32>
    %320 = arith.mulf %319, %283 : vector<16x32xf32>
    %cst_139 = arith.constant 1.000000e+00 : f32
    %321 = vector.broadcast %cst_139 : f32 to vector<16x32xf32>
    %322 = arith.addf %321, %318 : vector<16x32xf32>
    %323 = arith.mulf %320, %322 : vector<16x32xf32>
    %c264_140 = arith.constant 264 : index
    %c64_141 = arith.constant 64 : index
    %324 = vector.load %arg4[%c264_140, %c64_141] : memref<384x128xf32, #tpu.memory_space<vmem>>, vector<32x32xf32>
    %cst_142 = arith.constant dense<0.000000e+00> : vector<16x32xf32>
    %325 = tpu.matmul %323, %324, %cst_142 {dimension_numbers = #tpu.dot_dimension_numbers<[1], [0], [0], [1], [0, 0, 1, 1], [], []>} : vector<16x32xf32>, vector<32x32xf32>, vector<16x32xf32> -> vector<16x32xf32>
    %c296 = arith.constant 296 : index
    %c0_143 = arith.constant 0 : index
    %326 = vector.load %arg4[%c296, %c0_143] : memref<384x128xf32, #tpu.memory_space<vmem>>, vector<1x32xf32>
    %327 = vector.broadcast %326 : vector<1x32xf32> to vector<16x32xf32>
    %328 = arith.addf %325, %327 : vector<16x32xf32>
    %c297 = arith.constant 297 : index
    %c0_144 = arith.constant 0 : index
    %329 = vector.load %arg4[%c297, %c0_144] : memref<384x128xf32, #tpu.memory_space<vmem>>, vector<1x32xf32>
    %330 = vector.broadcast %329 : vector<1x32xf32> to vector<16x32xf32>
    %331 = arith.mulf %330, %128 : vector<16x32xf32>
    %332 = arith.addf %328, %331 : vector<16x32xf32>
    %c344 = arith.constant 344 : index
    %c0_145 = arith.constant 0 : index
    %333 = vector.load %arg4[%c344, %c0_145] : memref<384x128xf32, #tpu.memory_space<vmem>>, vector<32x4xf32>
    %cst_146 = arith.constant dense<0.000000e+00> : vector<16x4xf32>
    %334 = tpu.matmul %332, %333, %cst_146 {dimension_numbers = #tpu.dot_dimension_numbers<[1], [0], [0], [1], [0, 0, 1, 1], [], []>} : vector<16x32xf32>, vector<32x4xf32>, vector<16x4xf32> -> vector<16x4xf32>
    %c376 = arith.constant 376 : index
    %c0_147 = arith.constant 0 : index
    %335 = vector.load %arg4[%c376, %c0_147] : memref<384x128xf32, #tpu.memory_space<vmem>>, vector<1x4xf32>
    %336 = vector.broadcast %335 : vector<1x4xf32> to vector<16x4xf32>
    %337 = arith.addf %334, %336 : vector<16x4xf32>
    %c0_148 = arith.constant 0 : index
    %c0_149 = arith.constant 0 : index
    %338 = vector.load %arg5[%c0_148, %c0_149] : memref<16x4xf32, #tpu.memory_space<vmem>>, vector<16x4xf32>
    tpu.vector_store %arg5[%c0_148, %c0_149], %337 {strides = array<i32>} : memref<16x4xf32, #tpu.memory_space<vmem>>, vector<16x4xf32>,
    return
  }
}

</mosaic_0001>

<bundles_post_ra>
// kernel: tpu_custom_call.1
= control target key start
LH: loop header
LB: loop body
LE: loop exit
PB: predicated region body
PF: predicated region fallthrough
CT: control target
= control target key end

     0   :  { %10 = vsyncpa [#allocation3], 0  ;;  %s3779_s0 = inlined_call_operand.vmem [shape: f32[16,12], index: 0, kind: input, shape index: {}]   ;;  %s3780_s1 = inlined_call_operand.vmem [shape: f32[8,6], index: 1, kind: input, shape index: {}]   ;;  %s3781_s2 = inlined_call_operand.hbm [shape: f32[8,16], index: 2, kind: input, shape index: {}]   ;;  %s3782_s3 = inlined_call_operand.vmem [shape: f32[16,8], index: 3, kind: input, shape index: {}]   ;;  %s3783_s4 = inlined_call_operand.hbm [shape: f32[384,128], index: 4, kind: input, shape index: {}]   ;;  %s3784_s5 = inlined_call_operand.vmem [shape: f32[16,4], index: 5, kind: output, shape index: {}]  }
   0x1   :  { %11 = vsyncpa [#allocation5], 0  ;;  %s3341_s18 = smov [#allocation2]   ;;  %s3342_s20 = smov [#allocation4]  }
   0x2   :  { %s22_s19 = sshll.u32 %s3341_s18, 4  ;;  %s33_s21 = sshll.u32 %s3342_s20, 4  ;;  %s23_s19 = int_to_ptr.vmem [resolvable:$true] %s22_s19  ;;  %s34_s21 = int_to_ptr.vmem [resolvable:$true] %s33_s21 }
   0x3   :  { %s3305_s22 = scalar_lea.vmem %s23_s19, 128  ;;  %p3310_p1 = scmp.lt.s32.totalorder %s23_s19, %s23_s19 }
   0x4   :  { %p3306_p0 = scmp.ne.s32.totalorder %s23_s19, %s3305_s22  ;;  %p3311_p2 = scmp.lt.s32.totalorder %s3305_s22, %s3305_s22 }
   0x6   :  { %p3312_p3 = por %p3311_p2, %p3310_p1 }
   0x8   :  { %p3313_p4 = pnand %p3312_p3, %p3306_p0 }
   0xa   :  { %3316 = shalt.err (!%p3313_p4)
}
   0xb   :  { %25 = dma.hbm_to_vmem [thread:$0]  %s3781_s2, 128, %s23_s19, [#allocation3]  }
   0xc   :  { %s3325_s25 = scalar_lea.vmem %s34_s21, 6144  ;;  %p3330_p6 = scmp.lt.s32.totalorder %s34_s21, %s34_s21 }
   0xd   :  { %p3326_p5 = scmp.ne.s32.totalorder %s34_s21, %s3325_s25  ;;  %p3331_p7 = scmp.lt.s32.totalorder %s3325_s25, %s3325_s25 }
   0xf   :  { %p3332_p8 = por %p3331_p7, %p3330_p6 }
  0x11   :  { %p3333_p9 = pnand %p3332_p8, %p3326_p5 }
  0x13   :  { %3336 = shalt.err (!%p3333_p9)
}
  0x14   :  { %s3343_s26 = smov 128   ;;  %s3344_s27 = smov 8  }
  0x15   :  { %39 = dma.hbm_to_vmem [thread:$0]  %s3783_s4, 6144, %s34_s21, [#allocation5], %s3343_s26, %s3343_s26, %s3344_s27  }
  0x16   :  { %3337 = dma.done.wait [#allocation3], 128  }
  0x17   :  { %3338 = vsyncadd [#allocation3], 4294967168 }
  0x18   :  { %3339 = dma.done.wait [#allocation5], 6144  }
  0x19   :  { %3340 = vsyncadd [#allocation5], 4294961152  ;;  %v3345_v0 = vmov 0.0   ;;  %vm3346_vm0 = vmmov 0   ;;  %vm154_vm1 = vcmask 1045504   ;;  %vm62_vm2 = vcmask 1043456  }
  0x1a   :  { %2999 = vmatprep.subr.mxu1 %v3345_v0  ;;  %3001 = vmatprep.mubr.msk.f32.mxu1 %vm3346_vm0, %v3345_v0  ;;  %vm150_vm3 = vcmask 48128   ;;  %v144_v1 = vld [vmem:[#allocation4 + $0x10] sm:$0x3f]  ;;  %v143_v2 = vld [vmem:[%s3780_s1] sm:$0xff]  ;;  %v49_v3 = vld [vmem:[#allocation4 + $0x8] sm:$0xf] }
  0x1b   :  { %vm55_vm4 = vcmask 97280   ;;  %3000 = vmatpush3.msk.msra.mxu1 %vm154_vm1, %v144_v1  ;;  %2992 = vmatprep.subr.msk.mxu0 %vm62_vm2, %v49_v3  ;;  %v48_v4 = vld [vmem:[#allocation4] sm:$0xff]  ;;  %v46_v5 = vld [vmem:[%s3779_s0] sm:$0xff]  ;;  %v328_v8 = vld [vmem:[#allocation4 + $0x50] sm:$0xff]  ;;  %vm244_vm5 = vcmask 261120   ;;  %s3348_s1 = smov 80  }
  0x1c   :  { %3002 = vmatmul.mubr.msk.f32.vlgmr.msra.gmra.mxu1 %vm150_vm3, %v143_v2  ;;  %2993 = vmatpush3.msk.msra.mxu0 %vm62_vm2, %v49_v3  ;;  %v47_v6 = vld [vmem:[%s3779_s0 + $0x8] sm:$0xff]  ;;  %v329_v7 = vld [vmem:[#allocation4 + $0x58] sm:$0xff]  ;;  %v327_v9 = vld [vmem:[#allocation4 + $0x48] sm:$0xff]  ;;  %s3347_s0 = smov 96   ;;  %vm581_vm6 = vcmask 130048   ;;  %s3349_s9 = smov 112  }
  0x1d   :  { %2994 = vmatprep.subr.mxu0 %v48_v4  ;;  %2996 = vmatprep.mubr.msk.f32.mxu0 %vm55_vm4, %v46_v5  ;;  %v326_v10 = vld [vmem:[#allocation4 + $0x40] sm:$0xff]  ;;  %v238_v11 = vld [vmem:[#allocation4 + $0x30] sm:$0xff]  ;;  %v237_v12 = vld [vmem:[#allocation4 + $0x28] sm:$0xff]  ;;  %s3350_s10 = smov 64   ;;  %vm666_vm8 = vcmask 64512  }
  0x1e   :  { %2995 = vmatpush3.msra.mxu0 %v48_v4  ;;  %3004 = vmatprep.subr.mxu1 %v238_v11  ;;  %v236_v13 = vld [vmem:[#allocation4 + $0x20] sm:$0xff]  ;;  %v235_v14 = vld [vmem:[#allocation4 + $0x18] sm:$0xff]  ;;  %v2810_v15 = vld [vmem:[#allocation4 + $0x16] ss:$0 sm:$0xff] }
  0x1f   :  { %2997 = vmatmul.mubr.msk.f32.vlgmr.msra.gmra.mxu0 %vm55_vm4, %v47_v6  ;;  %3015 = vmatprep.subr.mxu0 %v3345_v0  ;;  %v2806_v18 = vld [vmem:[#allocation4 + $0xc] ss:$0 sm:$0xff]  ;;  %v3422_v27 = vld [vmem:[#allocation4 + $0xd0] sm:$0xff]  ;;  %v3438_v29 = vld [vmem:[#allocation4 + $0xc0] sm:$0xff] }
  0x20   :  { %3016 = vmatpush3.msra.mxu0 %v329_v7  ;;  %3023 = vmatprep.mubr.msk.f32.mxu0 %vm3346_vm0, %v3345_v0  ;;  %v3430_v28 = vld [vmem:[#allocation4 + $0xc8] sm:$0xff]  ;;  %v3442_v30 = vld [vmem:[#allocation4 + $0xb8] sm:$0xff]  ;;  %v2816_v31 = vld [vmem:[#allocation4 + $0x60] ss:$0 sm:$0xff] }
  0x21   :  { %3017 = vmatprep.subr.mxu0 %v3345_v0  ;;  %3005 = vmatpush3.msra.mxu1 %v238_v11  ;;  %v2813_v36 = vld [vmem:[#allocation4 + $0x38] ss:$0 sm:$0xff]  ;;  %v3487_v52 = vld [vmem:[%s3782_s3 + $0x8] sm:$0xff] }
  0x22   :  { %3018 = vmatpush3.msra.mxu0 %v328_v8  ;;  %3006 = vmatprep.subr.mxu1 %v237_v12  ;;  %v3492_v53 = vld [vmem:[%s3782_s3] sm:$0xff]  ;;  %vm234_vm7 = vcmp.gt.f32.partialorder %v3487_v52, 0.0  ;;  %s3351_s3 = smov 16  }
  0x23   :  { %3019 = vmatprep.subr.mxu0 %v3345_v0  ;;  %3007 = vmatpush3.msra.mxu1 %v237_v12  ;;  %vm233_vm9 = vcmp.gt.f32.partialorder %v3492_v53, 0.0 }
  0x24   :  { %3020 = vmatpush3.msra.mxu0 %v327_v9  ;;  %3008 = vmatprep.subr.mxu1 %v236_v13 }
  0x25   :  { %3021 = vmatprep.subr.mxu0 %v3345_v0  ;;  %3009 = vmatpush3.msra.mxu1 %v236_v13 }
  0x26   :  { %3022 = vmatpush3.msra.mxu0 %v326_v10  ;;  %3010 = vmatprep.subr.mxu1 %v235_v14 }
  0x27   :  { %3037 = vmatprep.subr.mxu0 %v3345_v0  ;;  %3011 = vmatpush3.msra.mxu1 %v235_v14 }
  0x28   :  { %3026 = vmatprep.subr.mxu1 %v3345_v0 }
  0xdc   :  { %v224_v16 = vpop.f32.mrf.mxu1 }
  0xdd   :  { %v3408_v17 = vadd.f32 %v2810_v15, %v224_v16 }
  0xde   :  { %v3003_v19 = vpop.f32.mrf.mxu1 }
  0xdf   :  { %v228_v20 = vmax.f32 %v3408_v17, 0.0  ;;  %v2998_v21 = vpop.f32.mrf.mxu0 }
  0xe0   :  { %v3411_v22 = vadd.f32 %v2998_v21, %v2806_v18 }
  0xe1   :  { %3024 = vmatmul.mubr.msk.f32.vlgmr.msra.gmra.mxu0 %vm244_vm5, %v228_v20  ;;  %v132_v23 = vpop.f32.mrf.mxu0 }
  0xe2   :  { %v3416_v24 = vadd.f32 %v2806_v18, %v132_v23  ;;  %3045 = vmatprep.mubr.msk.f32.mxu0 %vm3346_vm0, %v3345_v0  ;;  %v142_v25 = vmax.f32 %v3411_v22, 0.0  ;;  %v3636_v22 = vld [vmem:[#allocation4 + $0x120] sm:$0xff] }
  0xe4   :  { %v141_v26 = vmax.f32 %v3416_v24, 0.0 }
  0xe6   :  { %3012 = vmatprep.mubr.msk.f32.mxu1 %vm244_vm5, %v141_v26 }
  0xe7   :  { %3013 = vmatmul.mubr.msk.f32.vlgmr.msra.gmra.mxu1 %vm244_vm5, %v142_v25 }
  0xe8   :  { %3027 = vmatpush3.msra.mxu1 %v3422_v27  ;;  %3034 = vmatprep.mubr.msk.f32.mxu1 %vm3346_vm0, %v3345_v0 }
  0xe9   :  { %3028 = vmatprep.subr.mxu1 %v3345_v0 }
  0xea   :  { %3029 = vmatpush3.msra.mxu1 %v3430_v28 }
  0xeb   :  { %3030 = vmatprep.subr.mxu1 %v3345_v0 }
  0xec   :  { %3031 = vmatpush3.msra.mxu1 %v3438_v29 }
  0xed   :  { %3032 = vmatprep.subr.mxu1 %v3345_v0 }
  0xee   :  { %3033 = vmatpush3.msra.mxu1 %v3442_v30 }
 0x1a1   :  { %v404_v32 = vpop.f32.mrf.mxu0 }
 0x1a2   :  { %v3445_v33 = vadd.f32 %v2816_v31, %v404_v32 }
 0x1a3   :  { %v3025_v34 = vpop.f32.mrf.mxu0 }
 0x1a4   :  { %3035 = vmatmul.mubr.msk.f32.vlgmr.msra.gmra.mxu1 %vm244_vm5, %v3445_v33 }
 0x1a7   :  { %v3014_v35 = vpop.f32.mrf.mxu1 }
 0x1a8   :  { %v3451_v39 = vadd.f32 %v3014_v35, %v2813_v36 }
 0x1a9   :  { %v317_v37 = vpop.f32.mrf.mxu1 }
 0x1aa   :  { %v3449_v38 = vadd.f32 %v2813_v36, %v317_v37 }
 0x1ac   :  { %577 = vrot.lane.b32.xlu0 %v3449_v38, %s3347_s0 }
 0x1b0   :  { %579 = vrot.lane.b32.xlu0 %v3451_v39, %s3347_s0 }
 0x1b4   :  { %776 = vrot.lane.b32.xlu0 %v3451_v39, %s3348_s1 }
 0x1b8   :  { %495 = vrot.lane.b32.xlu0 %v3430_v28, %s3347_s0 }
 0x1bc   :  { %491 = vrot.lane.b32.xlu0 %v3442_v30, %s3347_s0 }
 0x21e   :  { %v578_v40 = vpop.permute.xlu0 %577 }
 0x21f   :  { %3050 = vmatprep.mubr.msk.f32.mxu1 %vm581_vm6, %v578_v40 }
 0x222   :  { %v580_v43 = vpop.permute.xlu0 %579 }
 0x226   :  { %v777_v45 = vpop.permute.xlu0 %776 }
 0x22a   :  { %v496_v47 = vpop.permute.xlu0 %495 }
 0x22e   :  { %v492_v50 = vpop.permute.xlu0 %491 }
 0x264   :  { %v481_v41 = vpop.f32.mrf.mxu1 }
 0x265   :  { %778 = vrot.lane.b32.xlu1 %v481_v41, %s3349_s9  ;;  %3048 = vmatprep.subr.msk.mxu1 %vm581_vm6, %v481_v41 }
 0x266   :  { %v3036_v42 = vpop.f32.mrf.mxu1  ;;  %3049 = vmatpush3.xpose.msk.msra.mxu1 %vm581_vm6, %v481_v41 }
 0x269   :  { %774 = vrot.lane.b32.xlu1 %v3449_v38, %s3348_s1  ;;  %3051 = vmatmul.mubr.msk.f32.vlgmr.msra.gmra.mxu1 %vm581_vm6, %v580_v43 }
 0x26d   :  { %497 = vrot.lane.b32.xlu1 %v3422_v27, %s3347_s0 }
 0x271   :  { %493 = vrot.lane.b32.xlu1 %v3438_v29, %s3347_s0 }
 0x275   :  { %485 = vrot.lane.b32.xlu1 %v3445_v33, %s3350_s10 }
 0x2d7   :  { %v779_v44 = vpop.permute.xlu1 %778 }
 0x2d8   :  { %3058 = vmatprep.subr.msk.mxu1 %vm581_vm6, %v779_v44 }
 0x2d9   :  { %3059 = vmatpush3.xpose.msk.msra.mxu1 %vm581_vm6, %v779_v44 }
 0x2db   :  { %v775_v46 = vpop.permute.xlu1 %774 }
 0x2dc   :  { %3060 = vmatprep.mubr.msk.f32.mxu1 %vm581_vm6, %v775_v46 }
 0x2dd   :  { %3061 = vmatmul.mubr.msk.f32.vlgmr.msra.gmra.mxu1 %vm581_vm6, %v777_v45 }
 0x2df   :  { %v498_v48 = vpop.permute.xlu1 %497 }
 0x2e0   :  { %3038 = vmatpush3.msra.mxu0 %v498_v48 }
 0x2e1   :  { %3039 = vmatprep.subr.mxu0 %v3345_v0 }
 0x2e2   :  { %3040 = vmatpush3.msra.mxu0 %v496_v47 }
 0x2e3   :  { %v494_v49 = vpop.permute.xlu1 %493  ;;  %3041 = vmatprep.subr.mxu0 %v3345_v0 }
 0x2e4   :  { %3042 = vmatpush3.msra.mxu0 %v494_v49 }
 0x2e5   :  { %3043 = vmatprep.subr.mxu0 %v3345_v0 }
 0x2e6   :  { %3044 = vmatpush3.msra.mxu0 %v492_v50 }
 0x2e7   :  { %v486_v51 = vpop.permute.xlu1 %485 }
 0x2e8   :  { %3046 = vmatmul.mubr.msk.f32.vlgmr.msra.gmra.mxu0 %vm244_vm5, %v486_v51 }
 0x329   :  { %v3052_v54 = vpop.f32.mrf.mxu1 }
 0x32a   :  { %v665_v55 = vsel %vm234_vm7, %v3052_v54, -1e+30 }
 0x32b   :  { %v655_v56 = vpop.f32.mrf.mxu1  ;;  %v670_v57 = vsel %vm666_vm8, %v665_v55, -inf }
 0x32c   :  { %v664_v58 = vsel %vm233_vm9, %v655_v56, -1e+30  ;;  %671 = vmax.xlane.f32.xlu1 %v670_v57  ;;  %v3527_v56 = vld [vmem:[#allocation4 + $0xf8] sm:$0xff] }
 0x32d   :  { %v667_v59 = vsel %vm666_vm8, %v664_v58, -inf }
 0x32e   :  { %668 = vmax.xlane.f32.xlu0 %v667_v59 }
 0x39d   :  { %v3062_v60 = vpop.f32.mrf.mxu1 }
 0x39e   :  { %v862_v1 = vsel %vm234_vm7, %v3062_v60, -1e+30 }
 0x39f   :  { %v852_v61 = vpop.f32.mrf.mxu1  ;;  %v866_v2 = vsel %vm666_vm8, %v862_v1, -inf }
 0x3a0   :  { %v861_v62 = vsel %vm233_vm9, %v852_v61, -1e+30  ;;  %v3531_v61 = vld [vmem:[#allocation4 + $0xf0] sm:$0xff] }
 0x3a1   :  { %v863_v63 = vsel %vm666_vm8, %v861_v62, -inf }
 0x3a2   :  { %864 = vmax.xlane.f32.xlu0 %v863_v63  ;;  %v3541_v63 = vld [vmem:[#allocation4 + $0xe0] sm:$0xff] }
 0x3a6   :  { %867 = vmax.xlane.f32.xlu0 %v866_v2 }
 0x3a8   :  { %v571_v3 = vpop.f32.mrf.mxu0 }
 0x3a9   :  { %3053 = vmatprep.subr.mxu0 %v571_v3 }
 0x3aa   :  { %v3047_v4 = vpop.f32.mrf.mxu0  ;;  %3054 = vmatpush3.msra.mxu0 %v571_v3 }
 0x3b5   :  { %v672_v5 = vpop.xlane.xlu1 %671 }
 0x3b6   :  { %v674_v6 = vsub.f32 %v665_v55, %v672_v5 }
 0x3b7   :  { %v669_v7 = vpop.xlane.xlu0 %668 }
 0x3b8   :  { %v677_v8 = vmul.f32 1.442695, %v674_v6  ;;  %v673_v9 = vsub.f32 %v664_v58, %v669_v7 }
 0x3ba   :  { %3237 = vpow2.f32 %v677_v8  ;;  %v675_v10 = vmul.f32 1.442695, %v673_v9 }
 0x3bc   :  { %3239 = vpow2.f32 %v675_v10 }
 0x3c7   :  { %v3238_v11 = vpop.eup %3237 }
 0x3c8   :  { %v680_v12 = vsel %vm234_vm7, %v3238_v11, 0.0 }
 0x3c9   :  { %v3240_v13 = vpop.eup %3239  ;;  %v684_v14 = vsel %vm666_vm8, %v680_v12, 0.0 }
 0x3ca   :  { %685 = vadd.xlane.f32.xlu0 %v684_v14  ;;  %v679_v15 = vsel %vm233_vm9, %v3240_v13, 0.0 }
 0x3cb   :  { %v681_v16 = vsel %vm666_vm8, %v679_v15, 0.0 }
 0x3cc   :  { %682 = vadd.xlane.f32.xlu1 %v681_v16 }
 0x42b   :  { %v865_v18 = vpop.xlane.xlu0 %864 }
 0x42c   :  { %v869_v19 = vsub.f32 %v861_v62, %v865_v18  ;;  %v3537_v62 = vld [vmem:[#allocation4 + $0xe8] sm:$0xff] }
 0x42e   :  { %v871_v21 = vmul.f32 1.442695, %v869_v19 }
 0x42f   :  { %v868_v23 = vpop.xlane.xlu0 %867 }
 0x430   :  { %3241 = vpow2.f32 %v871_v21  ;;  %v870_v31 = vsub.f32 %v862_v1, %v868_v23 }
 0x432   :  { %v873_v32 = vmul.f32 1.442695, %v870_v31 }
 0x434   :  { %3243 = vpow2.f32 %v873_v32 }
 0x43d   :  { %v3242_v34 = vpop.eup %3241 }
 0x43e   :  { %v875_v35 = vsel %vm233_vm9, %v3242_v34, 0.0 }
 0x43f   :  { %v877_v36 = vsel %vm666_vm8, %v875_v35, 0.0 }
 0x440   :  { %878 = vadd.xlane.f32.xlu1 %v877_v36 }
 0x441   :  { %v3244_v37 = vpop.eup %3243 }
 0x442   :  { %v876_v40 = vsel %vm234_vm7, %v3244_v37, 0.0 }
 0x443   :  { %v880_v41 = vsel %vm666_vm8, %v876_v40, 0.0 }
 0x444   :  { %881 = vadd.xlane.f32.xlu0 %v880_v41 }
 0x451   :  { %890 = vrot.lane.b32.xlu1 %v571_v3, %s3349_s9 }
 0x453   :  { %v686_v42 = vpop.xlane.xlu0 %685 }
 0x454   :  { %v688_v43 = vmax.f32 %v686_v42, 1e-30 }
 0x455   :  { %v683_v44 = vpop.xlane.xlu1 %682 }
 0x456   :  { %v687_v45 = vmax.f32 %v683_v44, 1e-30  ;;  %3245 = vrcp.f32 %v688_v43 }
 0x458   :  { %3247 = vrcp.f32 %v687_v45 }
 0x45a   :  { %1327 = vrot.lane.b32.xlu0 %v3445_v33, %s3347_s0 }
 0x45e   :  { %1494 = vrot.lane.b32.xlu0 %v3445_v33, %s3348_s1 }
 0x463   :  { %v3246_v46 = vpop.eup %3245 }
 0x464   :  { %v692_v49 = vmul.f32 %v3246_v46, %v680_v12 }
 0x465   :  { %v3248_v47 = vpop.eup %3247 }
 0x466   :  { %v690_v48 = vmul.f32 %v3248_v47, %v679_v15 }
 0x468   :  { %3055 = vmatprep.mubr.msk.f32.mxu0 %vm666_vm8, %v690_v48 }
 0x469   :  { %3056 = vmatmul.mubr.msk.f32.vlgmr.msra.gmra.mxu0 %vm666_vm8, %v692_v49 }
 0x4c9   :  { %v879_v50 = vpop.xlane.xlu1 %878 }
 0x4ca   :  { %v883_v51 = vmax.f32 %v879_v50, 1e-30 }
 0x4cc   :  { %3249 = vrcp.f32 %v883_v51 }
 0x4cd   :  { %v891_v54 = vpop.permute.xlu1 %890  ;;  %v882_v55 = vpop.xlane.xlu0 %881 }
 0x4ce   :  { %v884_v57 = vmax.f32 %v882_v55, 1e-30  ;;  %3063 = vmatprep.subr.mxu0 %v891_v54 }
 0x4cf   :  { %3064 = vmatpush3.msra.mxu0 %v891_v54 }
 0x4d0   :  { %3251 = vrcp.f32 %v884_v57  ;;  %3079 = vmatprep.subr.mxu0 %v3527_v56 }
 0x4d9   :  { %v3250_v33 = vpop.eup %3249 }
 0x4da   :  { %v886_v58 = vmul.f32 %v3250_v33, %v875_v35 }
 0x4dc   :  { %3065 = vmatprep.mubr.msk.f32.mxu0 %vm666_vm8, %v886_v58 }
 0x4dd   :  { %v3252_v59 = vpop.eup %3251 }
 0x4de   :  { %v888_v60 = vmul.f32 %v3252_v59, %v876_v40 }
 0x4e0   :  { %3066 = vmatmul.mubr.msk.f32.vlgmr.msra.gmra.mxu0 %vm666_vm8, %v888_v60 }
 0x4e1   :  { %3080 = vmatpush3.msra.mxu0 %v3527_v56  ;;  %3087 = vmatprep.mubr.msk.f32.mxu0 %vm244_vm5, %v3449_v38 }
 0x4e2   :  { %3081 = vmatprep.subr.mxu0 %v3531_v61 }
 0x4e3   :  { %3082 = vmatpush3.msra.mxu0 %v3531_v61 }
 0x4e4   :  { %3083 = vmatprep.subr.mxu0 %v3537_v62 }
 0x4e5   :  { %3084 = vmatpush3.msra.mxu0 %v3537_v62 }
 0x4e6   :  { %3085 = vmatprep.subr.mxu0 %v3541_v63 }
 0x4e7   :  { %3086 = vmatpush3.msra.mxu0 %v3541_v63 }
 0x4e8   :  { %3088 = vmatmul.mubr.msk.f32.vlgmr.msra.gmra.mxu0 %vm244_vm5, %v3451_v39  ;;  %3101 = vmatprep.subr.mxu0 %v3345_v0 }
 0x4e9   :  { %3105 = vmatprep.mubr.msk.f32.mxu0 %vm3346_vm0, %v3345_v0 }
 0x529   :  { %v3057_v1 = vpop.f32.mrf.mxu0 }
 0x52b   :  { %v765_v2 = vpop.f32.mrf.mxu0 }
 0x5a0   :  { %v3067_v3 = vpop.f32.mrf.mxu0 }
 0x5a1   :  { %978 = vrot.lane.b32.xlu0 %v3067_v3, %s3351_s3 }
 0x5a2   :  { %v965_v4 = vpop.f32.mrf.mxu0 }
 0x5a5   :  { %1047 = vrot.lane.b32.xlu0 %v3430_v28, %s3350_s10  ;;  %v1328_v28 = vpop.permute.xlu0 %1327 }
 0x5a8   :  { %v3089_v5 = vpop.f32.mrf.mxu0 }
 0x5a9   :  { %1498 = vrot.lane.b32.xlu1 %v3089_v5, %s3349_s9  ;;  %3102 = vmatpush3.xpose.msk.msra.mxu0 %vm581_vm6, %v3089_v5 }
 0x5aa   :  { %1043 = vrot.lane.b32.xlu0 %v3442_v30, %s3350_s10  ;;  %3103 = vmatprep.subr.mxu0 %v3345_v0  ;;  %v1219_v6 = vpop.f32.mrf.mxu0  ;;  %v1495_v30 = vpop.permute.xlu0 %1494 }
 0x5ad   :  { %1496 = vrot.lane.b32.xlu1 %v1219_v6, %s3349_s9  ;;  %3104 = vmatpush3.xpose.msk.msra.mxu0 %vm581_vm6, %v1219_v6 }
 0x5ae   :  { %1240 = vrot.lane.b32.xlu0 %v3531_v61, %s3347_s0  ;;  %3115 = vmatprep.subr.mxu0 %v3345_v0 }
 0x5b0   :  { %3106 = vmatmul.mubr.msk.f32.vlgmr.msra.gmra.mxu0 %vm581_vm6, %v1328_v28 }
 0x5b1   :  { %976 = vrot.lane.b32.xlu1 %v965_v4, %s3351_s3  ;;  %3119 = vmatprep.mubr.msk.f32.mxu0 %vm3346_vm0, %v3345_v0 }
 0x5b2   :  { %1236 = vrot.lane.b32.xlu0 %v3541_v63, %s3347_s0 }
 0x5b5   :  { %1049 = vrot.lane.b32.xlu1 %v3422_v27, %s3350_s10 }
 0x5b6   :  { %1230 = vrot.lane.b32.xlu0 %v3451_v39, %s3350_s10 }
 0x5b9   :  { %1045 = vrot.lane.b32.xlu1 %v3438_v29, %s3350_s10 }
 0x5bd   :  { %1242 = vrot.lane.b32.xlu1 %v3527_v56, %s3347_s0 }
 0x5c1   :  { %1238 = vrot.lane.b32.xlu1 %v3537_v62, %s3347_s0 }
 0x5c5   :  { %1228 = vrot.lane.b32.xlu1 %v3449_v38, %s3350_s10 }
 0x613   :  { %v979_v7 = vpop.permute.xlu0 %978 }
 0x614   :  { %v3584_v8 = vsel %vm581_vm6, %v3057_v1, %v979_v7 }
 0x615   :  { %v3587_v27 = vmul.f32 0.70710677, %v3584_v8 }
 0x617   :  { %v987_v39 = vand.u32 2147483647, %v3587_v27  ;;  %v1048_v14 = vpop.permute.xlu0 %1047  ;;  %vm1027_vm10 = vcmp.lt.f32.partialorder %v3587_v27, 0.0 }
 0x619   :  { %v989_v29 = vmul.f32 0.3275911, %v987_v39  ;;  %v1015_v21 = vsub.f32 0.0, %v987_v39 }
 0x61b   :  { %v991_v9 = vadd.f32 1.0, %v989_v29  ;;  %v1499_v10 = vpop.permute.xlu1 %1498  ;;  %v1017_v36 = vmul.f32 %v1015_v21, %v987_v39 }
 0x61c   :  { %3116 = vmatpush3.xpose.msk.msra.mxu0 %vm581_vm6, %v1499_v10  ;;  %v1044_v35 = vpop.permute.xlu0 %1043 }
 0x61d   :  { %3253 = vrcp.f32 %v991_v9  ;;  %3117 = vmatprep.subr.mxu0 %v3345_v0  ;;  %v1020_v42 = vmul.f32 1.442695, %v1017_v36  ;;  %v1801_v36 = vld [vmem:[#allocation4 + $0x70] sm:$0xff] }
 0x61f   :  { %v1497_v11 = vpop.permute.xlu1 %1496 }
 0x620   :  { %3118 = vmatpush3.xpose.msk.msra.mxu0 %vm581_vm6, %v1497_v11 }
 0x623   :  { %v977_v38 = vpop.permute.xlu1 %976  ;;  %3120 = vmatmul.mubr.msk.f32.vlgmr.msra.gmra.mxu0 %vm581_vm6, %v1495_v30 }
 0x624   :  { %v982_v12 = vsel %vm581_vm6, %v765_v2, %v977_v38  ;;  %v1241_v38 = vpop.permute.xlu0 %1240 }
 0x625   :  { %v984_v13 = vmul.f32 0.70710677, %v982_v12 }
 0x627   :  { %v986_v15 = vand.u32 2147483647, %v984_v13  ;;  %v1050_v16 = vpop.permute.xlu1 %1049  ;;  %vm1026_vm11 = vcmp.lt.f32.partialorder %v984_v13, 0.0 }
 0x628   :  { %3068 = vmatprep.subr.mxu1 %v1050_v16  ;;  %v1237_v27 = vpop.permute.xlu0 %1236 }
 0x629   :  { %v988_v18 = vmul.f32 0.3275911, %v986_v15  ;;  %3069 = vmatpush3.msra.mxu1 %v1050_v16  ;;  %v1014_v44 = vsub.f32 0.0, %v986_v15  ;;  %v1033_v16 = vmul.f32 0.5, %v3584_v8  ;;  %v3604_v8 = vld [vmem:[#allocation2] sm:$0xff] }
 0x62a   :  { %v3254_v19 = vpop.eup %3253  ;;  %3070 = vmatprep.subr.mxu1 %v1048_v14  ;;  %vm230_vm12 = vcmp.gt.f32.partialorder %v3604_v8, 0.0 }
 0x62b   :  { %v997_v23 = vmul.f32 1.0614054, %v3254_v19  ;;  %v990_v31 = vadd.f32 1.0, %v988_v18  ;;  %v1046_v32 = vpop.permute.xlu1 %1045  ;;  %3071 = vmatpush3.msra.mxu1 %v1048_v14  ;;  %v1016_v46 = vmul.f32 %v1014_v44, %v986_v15  ;;  %v1032_v14 = vmul.f32 0.5, %v982_v12 }
 0x62c   :  { %3072 = vmatprep.subr.mxu1 %v1046_v32  ;;  %v1231_v12 = vpop.permute.xlu0 %1230 }
 0x62d   :  { %v999_v34 = vadd.f32 -1.4531521, %v997_v23  ;;  %3255 = vrcp.f32 %v990_v31  ;;  %3073 = vmatpush3.msra.mxu1 %v1046_v32  ;;  %v1018_v50 = vmul.f32 1.442695, %v1016_v46 }
 0x62e   :  { %3074 = vmatprep.subr.mxu1 %v1044_v35  ;;  %3257 = vpow2.f32 %v1020_v42 }
 0x62f   :  { %v1001_v37 = vmul.f32 %v3254_v19, %v999_v34  ;;  %v1243_v40 = vpop.permute.xlu1 %1242  ;;  %3075 = vmatpush3.msra.mxu1 %v1044_v35  ;;  %3259 = vpow2.f32 %v1018_v50  ;;  %v1803_v34 = vld [vmem:[#allocation4 + $0x80] sm:$0xff]  ;;  %v1802_v35 = vld [vmem:[#allocation4 + $0x78] sm:$0xff] }
 0x630   :  { %3090 = vmatprep.subr.mxu1 %v1243_v40  ;;  %3140 = vmatprep.subr.mxu0 %v1803_v34  ;;  %v2830_v50 = vld [vmem:[#allocation4 + $0xd8] ss:$0 sm:$0xff] }
 0x631   :  { %v1003_v41 = vadd.f32 1.4214138, %v1001_v37  ;;  %3141 = vmatpush3.msra.mxu0 %v1803_v34  ;;  %v1800_v37 = vld [vmem:[#allocation4 + $0x68] sm:$0xff] }
 0x632   :  { %3142 = vmatprep.subr.mxu0 %v1802_v35 }
 0x633   :  { %v1005_v43 = vmul.f32 %v3254_v19, %v1003_v41  ;;  %v1239_v11 = vpop.permute.xlu1 %1238  ;;  %3143 = vmatpush3.msra.mxu0 %v1802_v35 }
 0x634   :  { %3144 = vmatprep.subr.mxu0 %v1801_v36 }
 0x635   :  { %v1007_v45 = vadd.f32 -0.28449672, %v1005_v43  ;;  %3145 = vmatpush3.msra.mxu0 %v1801_v36 }
 0x636   :  { %3146 = vmatprep.subr.mxu0 %v1800_v37 }
 0x637   :  { %v1009_v47 = vmul.f32 %v3254_v19, %v1007_v45  ;;  %v1229_v21 = vpop.permute.xlu1 %1228  ;;  %3147 = vmatpush3.msra.mxu0 %v1800_v37 }
 0x638   :  { %3162 = vmatprep.subr.mxu0 %v3345_v0 }
 0x639   :  { %v1011_v51 = vadd.f32 0.2548296, %v1009_v47 }
 0x63a   :  { %v3256_v48 = vpop.eup %3255 }
 0x63b   :  { %v996_v49 = vmul.f32 1.0614054, %v3256_v48  ;;  %v1013_v57 = vmul.f32 %v3254_v19, %v1011_v51  ;;  %v3258_v58 = vpop.eup %3257  ;;  %v2833_v51 = vld [vmem:[#allocation4 + $0xd9] ss:$0 sm:$0xff] }
 0x63c   :  { %v3260_v6 = vpop.eup %3259 }
 0x63d   :  { %v998_v54 = vadd.f32 -1.4531521, %v996_v49  ;;  %v1023_v60 = vmul.f32 %v3258_v58, %v1013_v57 }
 0x63f   :  { %v1000_v55 = vmul.f32 %v3256_v48, %v998_v54  ;;  %v1025_v3 = vsub.f32 1.0, %v1023_v60 }
 0x641   :  { %v1002_v33 = vadd.f32 1.4214138, %v1000_v55  ;;  %v1029_v28 = vsub.f32 0.0, %v1025_v3 }
 0x643   :  { %v1004_v59 = vmul.f32 %v3256_v48, %v1002_v33  ;;  %v1031_v39 = vsel %vm1027_vm10, %v1029_v28, %v1025_v3  ;;  %v1141_v33 = vmul.f32 %v2833_v51, %v141_v26 }
 0x644   :  { %v1035_v9 = vadd.f32 1.0, %v1031_v39 }
 0x645   :  { %v1006_v1 = vadd.f32 -0.28449672, %v1004_v59  ;;  %v1142_v59 = vmul.f32 %v2833_v51, %v142_v25  ;;  %v3644_v25 = vld [vmem:[#allocation4 + $0x110] sm:$0xff] }
 0x646   :  { %v1037_v19 = vmul.f32 %v1035_v9, %v1033_v16  ;;  %v2849_v9 = vld [vmem:[#allocation4 + $0x88] ss:$0 sm:$0xff] }
 0x647   :  { %v1008_v2 = vmul.f32 %v3256_v48, %v1006_v1 }
 0x649   :  { %v1010_v4 = vadd.f32 0.2548296, %v1008_v2 }
 0x64b   :  { %v1012_v5 = vmul.f32 %v3256_v48, %v1010_v4 }
 0x64d   :  { %v1022_v30 = vmul.f32 %v3260_v6, %v1012_v5 }
 0x64f   :  { %v1024_v7 = vsub.f32 1.0, %v1022_v30 }
 0x651   :  { %v1028_v29 = vsub.f32 0.0, %v1024_v7 }
 0x653   :  { %v1030_v10 = vsel %vm1026_vm11, %v1028_v29, %v1024_v7 }
 0x654   :  { %v1034_v15 = vadd.f32 1.0, %v1030_v10 }
 0x656   :  { %v1036_v18 = vmul.f32 %v1034_v15, %v1032_v14 }
 0x658   :  { %3076 = vmatprep.mubr.msk.f32.mxu1 %vm244_vm5, %v1036_v18 }
 0x659   :  { %3077 = vmatmul.mubr.msk.f32.vlgmr.msra.gmra.mxu1 %vm244_vm5, %v1037_v19 }
 0x65a   :  { %3091 = vmatpush3.msra.mxu1 %v1243_v40  ;;  %3098 = vmatprep.mubr.msk.f32.mxu1 %vm244_vm5, %v1229_v21 }
 0x65b   :  { %3092 = vmatprep.subr.mxu1 %v1241_v38 }
 0x65c   :  { %3093 = vmatpush3.msra.mxu1 %v1241_v38 }
 0x65d   :  { %3094 = vmatprep.subr.mxu1 %v1239_v11 }
 0x65e   :  { %3095 = vmatpush3.msra.mxu1 %v1239_v11 }
 0x65f   :  { %3096 = vmatprep.subr.mxu1 %v1237_v27 }
 0x660   :  { %3097 = vmatpush3.msra.mxu1 %v1237_v27 }
 0x661   :  { %3099 = vmatmul.mubr.msk.f32.vlgmr.msra.gmra.mxu1 %vm244_vm5, %v1231_v12  ;;  %3108 = vmatprep.subr.mxu1 %v3345_v0 }
 0x662   :  { %3112 = vmatprep.mubr.msk.f32.mxu1 %vm3346_vm0, %v3345_v0 }
 0x670   :  { %v1403_v13 = vpop.f32.mrf.mxu0 }
 0x671   :  { %v1407_v23 = vsel %vm230_vm12, %v1403_v13, -1e+30 }
 0x672   :  { %v3107_v31 = vpop.f32.mrf.mxu0  ;;  %v1408_v32 = vsel %vm581_vm6, %v1407_v23, -inf }
 0x673   :  { %1409 = vmax.xlane.f32.xlu1 %v1408_v32 }
 0x6e3   :  { %v1572_v40 = vpop.f32.mrf.mxu0 }
 0x6e4   :  { %v1576_v41 = vsel %vm230_vm12, %v1572_v40, -1e+30 }
 0x6e5   :  { %v3121_v42 = vpop.f32.mrf.mxu0  ;;  %v1577_v43 = vsel %vm581_vm6, %v1576_v41, -inf }
 0x6e6   :  { %1578 = vmax.xlane.f32.xlu0 %v1577_v43 }
 0x6fc   :  { %v1410_v44 = vpop.xlane.xlu1 %1409 }
 0x6fd   :  { %v1411_v45 = vsub.f32 %v1407_v23, %v1410_v44 }
 0x6ff   :  { %v1412_v46 = vmul.f32 1.442695, %v1411_v45 }
 0x701   :  { %3261 = vpow2.f32 %v1412_v46 }
 0x70e   :  { %v3262_v47 = vpop.eup %3261 }
 0x70f   :  { %v1414_v48 = vsel %vm230_vm12, %v3262_v47, 0.0 }
 0x710   :  { %v1415_v49 = vsel %vm581_vm6, %v1414_v48, 0.0 }
 0x711   :  { %1416 = vadd.xlane.f32.xlu0 %v1415_v49 }
 0x719   :  { %v3078_v54 = vpop.f32.mrf.mxu1 }
 0x71a   :  { %v1133_v55 = vadd.f32 %v3078_v54, %v2830_v50 }
 0x71b   :  { %v1127_v57 = vpop.f32.mrf.mxu1 }
 0x71c   :  { %v1128_v58 = vadd.f32 %v2830_v50, %v1127_v57  ;;  %v3623_v1 = vadd.f32 %v1142_v59, %v1133_v55 }
 0x71e   :  { %v3621_v60 = vadd.f32 %v1141_v33, %v1128_v58 }
 0x720   :  { %3148 = vmatprep.mubr.msk.f32.mxu0 %vm244_vm5, %v3621_v60 }
 0x721   :  { %v3100_v2 = vpop.f32.mrf.mxu1  ;;  %3149 = vmatmul.mubr.msk.f32.vlgmr.msra.gmra.mxu0 %vm244_vm5, %v3623_v1 }
 0x722   :  { %3109 = vmatpush3.msra.mxu1 %v3100_v2  ;;  %3170 = vmatprep.mubr.msk.f32.mxu0 %vm3346_vm0, %v3345_v0 }
 0x723   :  { %v1318_v24 = vpop.f32.mrf.mxu1  ;;  %3110 = vmatprep.subr.mxu1 %v3345_v0  ;;  %3163 = vmatpush3.msra.mxu0 %v3636_v22 }
 0x724   :  { %3111 = vmatpush3.msra.mxu1 %v1318_v24  ;;  %3164 = vmatprep.subr.mxu0 %v3345_v0 }
 0x725   :  { %3122 = vmatprep.subr.mxu1 %v3345_v0 }
 0x727   :  { %1594 = vrot.lane.b32.xlu0 %v3100_v2, %s3349_s9 }
 0x72b   :  { %1714 = vrot.lane.b32.xlu0 %v3527_v56, %s3350_s10 }
 0x72f   :  { %1710 = vrot.lane.b32.xlu0 %v3537_v62, %s3350_s10 }
 0x733   :  { %2061 = vrot.lane.b32.xlu0 %v3636_v22, %s3347_s0 }
 0x737   :  { %2057 = vrot.lane.b32.xlu0 %v3644_v25, %s3347_s0 }
 0x76f   :  { %v1579_v26 = vpop.xlane.xlu0 %1578 }
 0x770   :  { %v1580_v3 = vsub.f32 %v1576_v41, %v1579_v26 }
 0x772   :  { %v1581_v56 = vmul.f32 1.442695, %v1580_v3  ;;  %v1893_v3 = vld [vmem:[#allocation4 + $0xa8] sm:$0xff] }
 0x774   :  { %3263 = vpow2.f32 %v1581_v56  ;;  %v1892_v56 = vld [vmem:[#allocation4 + $0xa0] sm:$0xff] }
 0x781   :  { %v3264_v4 = vpop.eup %3263 }
 0x782   :  { %v1583_v62 = vsel %vm230_vm12, %v3264_v4, 0.0  ;;  %v1891_v4 = vld [vmem:[#allocation4 + $0x98] sm:$0xff] }
 0x783   :  { %v1584_v5 = vsel %vm581_vm6, %v1583_v62, 0.0 }
 0x784   :  { %1585 = vadd.xlane.f32.xlu1 %v1584_v5  ;;  %v3682_v5 = vld [vmem:[#allocation4 + $0x118] sm:$0xff] }
 0x785   :  { %3165 = vmatpush3.msra.mxu0 %v3682_v5 }
 0x786   :  { %3166 = vmatprep.subr.mxu0 %v3345_v0 }
 0x787   :  { %3167 = vmatpush3.msra.mxu0 %v3644_v25 }
 0x788   :  { %3168 = vmatprep.subr.mxu0 %v3345_v0 }
 0x795   :  { %1592 = vrot.lane.b32.xlu1 %v1318_v24, %s3349_s9 }
 0x79a   :  { %v1417_v6 = vpop.xlane.xlu0 %1416 }
 0x79b   :  { %v1418_v28 = vmax.f32 %v1417_v6, 1e-30  ;;  %v3688_v6 = vld [vmem:[#allocation4 + $0x108] sm:$0xff] }
 0x79c   :  { %3169 = vmatpush3.msra.mxu0 %v3688_v6 }
 0x79d   :  { %3265 = vrcp.f32 %v1418_v28  ;;  %v2848_v28 = vld [vmem:[#allocation4 + $0x101] ss:$0 sm:$0xff] }
 0x79e   :  { %v1595_v39 = vpop.permute.xlu0 %1594 }
 0x7a2   :  { %v1715_v21 = vpop.permute.xlu0 %1714 }
 0x7a6   :  { %v1711_v36 = vpop.permute.xlu0 %1710 }
 0x7aa   :  { %v3266_v30 = vpop.eup %3265 }
 0x7ab   :  { %v1420_v7 = vmul.f32 %v3266_v30, %v1414_v48  ;;  %v2846_v30 = vld [vmem:[#allocation4 + $0x100] ss:$0 sm:$0xff] }
 0x7ad   :  { %3113 = vmatmul.mubr.msk.f32.vlgmr.msra.gmra.mxu1 %vm581_vm6, %v1420_v7 }
 0x7ae   :  { %3123 = vmatpush3.msra.mxu1 %v1595_v39  ;;  %3126 = vmatprep.mubr.msk.f32.mxu1 %vm3346_vm0, %v3345_v0  ;;  %v1798_v39 = vmul.f32 %v2848_v28, %v228_v20  ;;  %v2852_v20 = vld [vmem:[#allocation4 + $0xb0] ss:$0 sm:$0xff] }
 0x7af   :  { %3124 = vmatprep.subr.mxu1 %v3345_v0 }
 0x7e1   :  { %v3150_v29 = vpop.f32.mrf.mxu0 }
 0x7e2   :  { %v3657_v38 = vadd.f32 %v3150_v29, %v2849_v9 }
 0x7e3   :  { %v1881_v10 = vpop.f32.mrf.mxu0 }
 0x7e4   :  { %v1882_v11 = vadd.f32 %v2849_v9, %v1881_v10 }
 0x7e6   :  { %2141 = vrot.lane.b32.xlu0 %v1882_v11, %s3347_s0 }
 0x7ea   :  { %2143 = vrot.lane.b32.xlu0 %v3657_v38, %s3347_s0 }
 0x7ee   :  { %2336 = vrot.lane.b32.xlu0 %v1882_v11, %s3348_s1  ;;  %v2062_v11 = vpop.permute.xlu0 %2061 }
 0x80d   :  { %v1586_v14 = vpop.xlane.xlu1 %1585 }
 0x80e   :  { %v1587_v15 = vmax.f32 %v1586_v14, 1e-30 }
 0x810   :  { %3267 = vrcp.f32 %v1587_v15  ;;  %v2058_v15 = vpop.permute.xlu0 %2057 }
 0x811   :  { %v1593_v16 = vpop.permute.xlu1 %1592 }
 0x812   :  { %3125 = vmatpush3.msra.mxu1 %v1593_v16 }
 0x813   :  { %3129 = vmatprep.subr.mxu1 %v3345_v0 }
 0x81d   :  { %v3268_v18 = vpop.eup %3267 }
 0x81e   :  { %v1589_v19 = vmul.f32 %v3268_v18, %v1583_v62  ;;  %v1890_v62 = vld [vmem:[#allocation4 + $0x90] sm:$0xff] }
 0x820   :  { %3127 = vmatmul.mubr.msk.f32.vlgmr.msra.gmra.mxu1 %vm581_vm6, %v1589_v19 }
 0x821   :  { %3130 = vmatpush3.msra.mxu1 %v1715_v21  ;;  %3137 = vmatprep.mubr.msk.f32.mxu1 %vm3346_vm0, %v3345_v0 }
 0x822   :  { %3131 = vmatprep.subr.mxu1 %v3345_v0 }
 0x858   :  { %v2142_v21 = vpop.permute.xlu0 %2141 }
 0x86d   :  { %v1490_v27 = vpop.f32.mrf.mxu1 }
 0x86f   :  { %v3114_v12 = vpop.f32.mrf.mxu1 }
 0x8e0   :  { %v1667_v8 = vpop.f32.mrf.mxu1 }
 0x8e1   :  { %1672 = vrot.lane.b32.xlu1 %v1667_v8, %s3351_s3 }
 0x8e2   :  { %v3128_v13 = vpop.f32.mrf.mxu1 }
 0x8e5   :  { %1712 = vrot.lane.b32.xlu1 %v3531_v61, %s3350_s10 }
 0x8e9   :  { %1708 = vrot.lane.b32.xlu1 %v3541_v63, %s3350_s10 }
 0x8ed   :  { %2059 = vrot.lane.b32.xlu1 %v3682_v5, %s3347_s0 }
 0x8f1   :  { %2055 = vrot.lane.b32.xlu1 %v3688_v6, %s3347_s0 }
 0x953   :  { %v1673_v23 = vpop.permute.xlu1 %1672 }
 0x954   :  { %v1675_v31 = vsel %vm581_vm6, %v1490_v27, %v1673_v23  ;;  %v2144_v27 = vpop.permute.xlu0 %2143 }
 0x955   :  { %v1676_v32 = vmul.f32 0.70710677, %v1675_v31  ;;  %v1700_v2 = vmul.f32 0.5, %v1675_v31 }
 0x957   :  { %v1677_v34 = vand.u32 2147483647, %v1676_v32  ;;  %v1713_v35 = vpop.permute.xlu1 %1712  ;;  %vm1697_vm13 = vcmp.lt.f32.partialorder %v1676_v32, 0.0 }
 0x958   :  { %3132 = vmatpush3.msra.mxu1 %v1713_v35  ;;  %v2337_v8 = vpop.permute.xlu0 %2336 }
 0x959   :  { %v1678_v37 = vmul.f32 0.3275911, %v1677_v34  ;;  %3133 = vmatprep.subr.mxu1 %v3345_v0  ;;  %v1691_v61 = vsub.f32 0.0, %v1677_v34 }
 0x95a   :  { %3134 = vmatpush3.msra.mxu1 %v1711_v36 }
 0x95b   :  { %v1679_v40 = vadd.f32 1.0, %v1678_v37  ;;  %v1709_v41 = vpop.permute.xlu1 %1708  ;;  %3135 = vmatprep.subr.mxu1 %v3345_v0  ;;  %v1692_v63 = vmul.f32 %v1691_v61, %v1677_v34 }
 0x95c   :  { %3136 = vmatpush3.msra.mxu1 %v1709_v41 }
 0x95d   :  { %3269 = vrcp.f32 %v1679_v40  ;;  %3151 = vmatprep.subr.mxu1 %v3345_v0  ;;  %v1693_v44 = vmul.f32 1.442695, %v1692_v63 }
 0x95f   :  { %3271 = vpow2.f32 %v1693_v44  ;;  %v2060_v14 = vpop.permute.xlu1 %2059 }
 0x963   :  { %v2056_v17 = vpop.permute.xlu1 %2055 }
 0x96a   :  { %v3270_v42 = vpop.eup %3269 }
 0x96b   :  { %v1682_v43 = vmul.f32 1.0614054, %v3270_v42 }
 0x96c   :  { %v3272_v55 = vpop.eup %3271 }
 0x96d   :  { %v1683_v45 = vadd.f32 -1.4531521, %v1682_v43 }
 0x96f   :  { %v1684_v46 = vmul.f32 %v3270_v42, %v1683_v45 }
 0x971   :  { %v1685_v47 = vadd.f32 1.4214138, %v1684_v46 }
 0x973   :  { %v1686_v48 = vmul.f32 %v3270_v42, %v1685_v47 }
 0x975   :  { %v1687_v49 = vadd.f32 -0.28449672, %v1686_v48 }
 0x977   :  { %v1688_v50 = vmul.f32 %v3270_v42, %v1687_v49 }
 0x979   :  { %v1689_v51 = vadd.f32 0.2548296, %v1688_v50 }
 0x97b   :  { %v1690_v54 = vmul.f32 %v3270_v42, %v1689_v51 }
 0x97d   :  { %v1695_v57 = vmul.f32 %v3272_v55, %v1690_v54 }
 0x97f   :  { %v1696_v33 = vsub.f32 1.0, %v1695_v57 }
 0x981   :  { %v1698_v58 = vsub.f32 0.0, %v1696_v33 }
 0x983   :  { %v1699_v59 = vsel %vm1697_vm13, %v1698_v58, %v1696_v33 }
 0x984   :  { %v1701_v24 = vadd.f32 1.0, %v1699_v59 }
 0x986   :  { %v1702_v26 = vmul.f32 %v1701_v24, %v1700_v2 }
 0x988   :  { %3138 = vmatmul.mubr.msk.f32.vlgmr.msra.gmra.mxu1 %vm244_vm5, %v1702_v26 }
 0x989   :  { %3152 = vmatpush3.msra.mxu1 %v1893_v3  ;;  %3159 = vmatprep.mubr.msk.f32.mxu1 %vm3346_vm0, %v3345_v0 }
 0x98a   :  { %3153 = vmatprep.subr.mxu1 %v3345_v0 }
 0x98b   :  { %3154 = vmatpush3.msra.mxu1 %v1892_v56 }
 0x98c   :  { %3155 = vmatprep.subr.mxu1 %v3345_v0 }
 0x98d   :  { %3156 = vmatpush3.msra.mxu1 %v1891_v4 }
 0x98e   :  { %3157 = vmatprep.subr.mxu1 %v3345_v0 }
 0x98f   :  { %3158 = vmatpush3.msra.mxu1 %v1890_v62 }
 0x990   :  { %3173 = vmatprep.subr.mxu1 %v3345_v0 }
 0xa48   :  { %v1789_v7 = vpop.f32.mrf.mxu1 }
 0xa49   :  { %v1790_v29 = vadd.f32 %v2846_v30, %v1789_v7 }
 0xa4a   :  { %v3139_v9 = vpop.f32.mrf.mxu1 }
 0xa4b   :  { %v1799_v10 = vadd.f32 %v1798_v39, %v1790_v29 }
 0xa4d   :  { %3160 = vmatmul.mubr.msk.f32.vlgmr.msra.gmra.mxu1 %vm244_vm5, %v1799_v10 }
 0xa4e   :  { %3174 = vmatpush3.msra.mxu1 %v2062_v11  ;;  %3181 = vmatprep.mubr.msk.f32.mxu1 %vm3346_vm0, %v3345_v0  ;;  %vm2797_vm0 = vcmask 31744  }
 0xa4f   :  { %3175 = vmatprep.subr.mxu1 %v3345_v0 }
 0xa50   :  { %3176 = vmatpush3.msra.mxu1 %v2060_v14 }
 0xa51   :  { %3177 = vmatprep.subr.mxu1 %v3345_v0 }
 0xa52   :  { %3178 = vmatpush3.msra.mxu1 %v2058_v15 }
 0xa53   :  { %3179 = vmatprep.subr.mxu1 %v3345_v0 }
 0xa54   :  { %3180 = vmatpush3.msra.mxu1 %v2056_v17 }
 0xb0d   :  { %v1968_v16 = vpop.f32.mrf.mxu1 }
 0xb0e   :  { %v1969_v18 = vadd.f32 %v2852_v20, %v1968_v16 }
 0xb0f   :  { %v3161_v19 = vpop.f32.mrf.mxu1 }
 0xb10   :  { %2049 = vrot.lane.b32.xlu1 %v1969_v18, %s3350_s10  ;;  %3171 = vmatmul.mubr.msk.f32.vlgmr.msra.gmra.mxu0 %vm244_vm5, %v1969_v18 }
 0xb11   :  { %3186 = vmatprep.mubr.msk.f32.mxu0 %vm581_vm6, %v2142_v21 }
 0xb82   :  { %v2050_v12 = vpop.permute.xlu1 %2049 }
 0xb83   :  { %3182 = vmatmul.mubr.msk.f32.vlgmr.msra.gmra.mxu1 %vm244_vm5, %v2050_v12 }
 0xb84   :  { %3196 = vmatprep.mubr.msk.f32.mxu1 %vm581_vm6, %v2337_v8 }
 0xbd0   :  { %v2045_v0 = vpop.f32.mrf.mxu0 }
 0xbd1   :  { %2340 = vrot.lane.b32.xlu1 %v2045_v0, %s3349_s9  ;;  %3184 = vmatprep.subr.msk.mxu0 %vm581_vm6, %v2045_v0 }
 0xbd2   :  { %v3172_v13 = vpop.f32.mrf.mxu0  ;;  %3185 = vmatpush3.xpose.msk.msra.mxu0 %vm581_vm6, %v2045_v0 }
 0xbd5   :  { %2338 = vrot.lane.b32.xlu1 %v3657_v38, %s3348_s1  ;;  %3187 = vmatmul.mubr.msk.f32.vlgmr.msra.gmra.mxu0 %vm581_vm6, %v2144_v27 }
 0xc43   :  { %v2341_v23 = vpop.permute.xlu1 %2340  ;;  %v2135_v31 = vpop.f32.mrf.mxu1 }
 0xc44   :  { %3189 = vmatprep.subr.mxu0 %v2135_v31  ;;  %3194 = vmatprep.subr.msk.mxu1 %vm581_vm6, %v2341_v23 }
 0xc45   :  { %v3183_v32 = vpop.f32.mrf.mxu1  ;;  %3190 = vmatpush3.msra.mxu0 %v2135_v31  ;;  %3195 = vmatpush3.xpose.msk.msra.mxu1 %vm581_vm6, %v2341_v23 }
 0xc47   :  { %v2339_v34 = vpop.permute.xlu1 %2338 }
 0xc48   :  { %3197 = vmatmul.mubr.msk.f32.vlgmr.msra.gmra.mxu1 %vm581_vm6, %v2339_v34 }
 0xc95   :  { %v3188_v35 = vpop.f32.mrf.mxu0 }
 0xc96   :  { %v2228_v36 = vsel %vm234_vm7, %v3188_v35, -1e+30 }
 0xc97   :  { %v2218_v37 = vpop.f32.mrf.mxu0  ;;  %v2232_v38 = vsel %vm666_vm8, %v2228_v36, -inf }
 0xc98   :  { %v2227_v40 = vsel %vm233_vm9, %v2218_v37, -1e+30  ;;  %2233 = vmax.xlane.f32.xlu1 %v2232_v38 }
 0xc99   :  { %v2229_v41 = vsel %vm666_vm8, %v2227_v40, -inf }
 0xc9a   :  { %2230 = vmax.xlane.f32.xlu0 %v2229_v41 }
 0xd08   :  { %v3198_v61 = vpop.f32.mrf.mxu1 }
 0xd09   :  { %v2424_v44 = vsel %vm234_vm7, %v3198_v61, -1e+30 }
 0xd0a   :  { %v2414_v63 = vpop.f32.mrf.mxu1  ;;  %v2428_v45 = vsel %vm666_vm8, %v2424_v44, -inf }
 0xd0b   :  { %v2423_v42 = vsel %vm233_vm9, %v2414_v63, -1e+30 }
 0xd0c   :  { %v2425_v43 = vsel %vm666_vm8, %v2423_v42, -inf }
 0xd0d   :  { %2426 = vmax.xlane.f32.xlu0 %v2425_v43 }
 0xd11   :  { %2429 = vmax.xlane.f32.xlu0 %v2428_v45 }
 0xd21   :  { %v2234_v46 = vpop.xlane.xlu1 %2233 }
 0xd22   :  { %v2236_v47 = vsub.f32 %v2228_v36, %v2234_v46 }
 0xd23   :  { %v2231_v48 = vpop.xlane.xlu0 %2230 }
 0xd24   :  { %v2239_v49 = vmul.f32 1.442695, %v2236_v47  ;;  %v2235_v50 = vsub.f32 %v2227_v40, %v2231_v48 }
 0xd26   :  { %3273 = vpow2.f32 %v2239_v49  ;;  %v2237_v51 = vmul.f32 1.442695, %v2235_v50 }
 0xd28   :  { %3275 = vpow2.f32 %v2237_v51 }
 0xd33   :  { %v3274_v54 = vpop.eup %3273 }
 0xd34   :  { %v2242_v55 = vsel %vm234_vm7, %v3274_v54, 0.0 }
 0xd35   :  { %v3276_v57 = vpop.eup %3275  ;;  %v2246_v33 = vsel %vm666_vm8, %v2242_v55, 0.0 }
 0xd36   :  { %2247 = vadd.xlane.f32.xlu0 %v2246_v33  ;;  %v2241_v58 = vsel %vm233_vm9, %v3276_v57, 0.0 }
 0xd37   :  { %v2243_v59 = vsel %vm666_vm8, %v2241_v58, 0.0 }
 0xd38   :  { %2244 = vadd.xlane.f32.xlu1 %v2243_v59 }
 0xd96   :  { %v2427_v2 = vpop.xlane.xlu0 %2426 }
 0xd97   :  { %v2431_v24 = vsub.f32 %v2423_v42, %v2427_v2 }
 0xd99   :  { %v2433_v26 = vmul.f32 1.442695, %v2431_v24 }
 0xd9a   :  { %v2430_v3 = vpop.xlane.xlu0 %2429 }
 0xd9b   :  { %3277 = vpow2.f32 %v2433_v26  ;;  %v2432_v56 = vsub.f32 %v2424_v44, %v2430_v3 }
 0xd9d   :  { %v2435_v4 = vmul.f32 1.442695, %v2432_v56 }
 0xd9f   :  { %3279 = vpow2.f32 %v2435_v4 }
 0xda8   :  { %v3278_v62 = vpop.eup %3277 }
 0xda9   :  { %v2437_v28 = vsel %vm233_vm9, %v3278_v62, 0.0 }
 0xdaa   :  { %v2439_v30 = vsel %vm666_vm8, %v2437_v28, 0.0 }
 0xdab   :  { %2440 = vadd.xlane.f32.xlu1 %v2439_v30 }
 0xdac   :  { %v3280_v7 = vpop.eup %3279 }
 0xdad   :  { %v2438_v39 = vsel %vm234_vm7, %v3280_v7, 0.0 }
 0xdae   :  { %v2442_v29 = vsel %vm666_vm8, %v2438_v39, 0.0 }
 0xdaf   :  { %2443 = vadd.xlane.f32.xlu0 %v2442_v29 }
 0xdbc   :  { %2452 = vrot.lane.b32.xlu1 %v2135_v31, %s3349_s9 }
 0xdbf   :  { %v2248_v9 = vpop.xlane.xlu0 %2247 }
 0xdc0   :  { %v2250_v10 = vmax.f32 %v2248_v9, 1e-30 }
 0xdc1   :  { %v2245_v11 = vpop.xlane.xlu1 %2244 }
 0xdc2   :  { %v2249_v14 = vmax.f32 %v2245_v11, 1e-30  ;;  %3281 = vrcp.f32 %v2250_v10 }
 0xdc4   :  { %3283 = vrcp.f32 %v2249_v14 }
 0xdcf   :  { %v3282_v53 = vpop.eup %3281 }
 0xdd0   :  { %v2254_v20 = vmul.f32 %v3282_v53, %v2242_v55 }
 0xdd1   :  { %v3284_v15 = vpop.eup %3283 }
 0xdd2   :  { %v2252_v17 = vmul.f32 %v3284_v15, %v2241_v58 }
 0xdd4   :  { %3191 = vmatprep.mubr.msk.f32.mxu0 %vm666_vm8, %v2252_v17 }
 0xdd5   :  { %3192 = vmatmul.mubr.msk.f32.vlgmr.msra.gmra.mxu0 %vm666_vm8, %v2254_v20 }
 0xe34   :  { %v2441_v52 = vpop.xlane.xlu1 %2440 }
 0xe35   :  { %v2445_v16 = vmax.f32 %v2441_v52, 1e-30 }
 0xe37   :  { %3285 = vrcp.f32 %v2445_v16 }
 0xe38   :  { %v2453_v18 = vpop.permute.xlu1 %2452  ;;  %v2444_v19 = vpop.xlane.xlu0 %2443 }
 0xe39   :  { %v2446_v21 = vmax.f32 %v2444_v19, 1e-30  ;;  %3199 = vmatprep.subr.mxu0 %v2453_v18 }
 0xe3a   :  { %3200 = vmatpush3.msra.mxu0 %v2453_v18 }
 0xe3b   :  { %3287 = vrcp.f32 %v2446_v21 }
 0xe44   :  { %v3286_v27 = vpop.eup %3285 }
 0xe45   :  { %v2448_v12 = vmul.f32 %v3286_v27, %v2437_v28 }
 0xe47   :  { %3201 = vmatprep.mubr.msk.f32.mxu0 %vm666_vm8, %v2448_v12 }
 0xe48   :  { %v3288_v8 = vpop.eup %3287 }
 0xe49   :  { %v2450_v0 = vmul.f32 %v3288_v8, %v2438_v39 }
 0xe4b   :  { %3202 = vmatmul.mubr.msk.f32.vlgmr.msra.gmra.mxu0 %vm666_vm8, %v2450_v0 }
 0xe95   :  { %v3193_v13 = vpop.f32.mrf.mxu0 }
 0xe97   :  { %v2327_v23 = vpop.f32.mrf.mxu0 }
 0xf0b   :  { %v3203_v31 = vpop.f32.mrf.mxu0 }
 0xf0c   :  { %2540 = vrot.lane.b32.xlu1 %v3203_v31, %s3351_s3  ;;  %v2708_v31 = vld [vmem:[#allocation4 + $0x160] sm:$0xff] }
 0xf0d   :  { %v2527_v32 = vpop.f32.mrf.mxu0 }
 0xf0e   :  { %2538 = vrot.lane.b32.xlu0 %v2527_v32, %s3351_s3  ;;  %v2707_v32 = vld [vmem:[#allocation4 + $0x158] sm:$0xff] }
 0xf10   :  { %2611 = vrot.lane.b32.xlu1 %v3636_v22, %s3350_s10 }
 0xf12   :  { %2609 = vrot.lane.b32.xlu0 %v3682_v5, %s3350_s10 }
 0xf14   :  { %2607 = vrot.lane.b32.xlu1 %v3644_v25, %s3350_s10 }
 0xf16   :  { %2605 = vrot.lane.b32.xlu0 %v3688_v6, %s3350_s10 }
 0xf7e   :  { %v2541_v34 = vpop.permute.xlu1 %2540 }
 0xf7f   :  { %v3758_v35 = vsel %vm581_vm6, %v3193_v13, %v2541_v34  ;;  %v2710_v13 = vld [vmem:[#allocation4 + $0x170] sm:$0xff]  ;;  %v2866_v34 = vld [vmem:[#allocation4 + $0x128] ss:$0 sm:$0xff] }
 0xf80   :  { %v2547_v36 = vmul.f32 0.70710677, %v3758_v35  ;;  %v2539_v37 = vpop.permute.xlu0 %2538  ;;  %v2595_v12 = vmul.f32 0.5, %v3758_v35  ;;  %3215 = vmatprep.subr.mxu0 %v2710_v13 }
 0xf81   :  { %v3762_v38 = vsel %vm581_vm6, %v2327_v23, %v2539_v37  ;;  %3216 = vmatpush3.msra.mxu0 %v2710_v13  ;;  %v2709_v23 = vld [vmem:[#allocation4 + $0x168] sm:$0xff] }
 0xf82   :  { %v2549_v22 = vand.u32 2147483647, %v2547_v36  ;;  %v2546_v40 = vmul.f32 0.70710677, %v3762_v38  ;;  %v2612_v5 = vpop.permute.xlu1 %2611  ;;  %vm2589_vm14 = vcmp.lt.f32.partialorder %v2547_v36, 0.0  ;;  %v2594_v21 = vmul.f32 0.5, %v3762_v38  ;;  %3217 = vmatprep.subr.mxu0 %v2709_v23 }
 0xf83   :  { %3204 = vmatprep.subr.mxu1 %v2612_v5  ;;  %3218 = vmatpush3.msra.mxu0 %v2709_v23  ;;  %v2869_v36 = vld [vmem:[#allocation4 + $0x129] ss:$0 sm:$0xff] }
 0xf84   :  { %v2551_v41 = vmul.f32 0.3275911, %v2549_v22  ;;  %v2548_v25 = vand.u32 2147483647, %v2546_v40  ;;  %3205 = vmatpush3.msra.mxu1 %v2612_v5  ;;  %v2610_v61 = vpop.permute.xlu0 %2609  ;;  %v2577_v45 = vsub.f32 0.0, %v2549_v22  ;;  %vm2588_vm15 = vcmp.lt.f32.partialorder %v2546_v40, 0.0  ;;  %3219 = vmatprep.subr.mxu0 %v2708_v31 }
 0xf85   :  { %3206 = vmatprep.subr.mxu1 %v2610_v61  ;;  %3220 = vmatpush3.msra.mxu0 %v2708_v31  ;;  %v2703_v40 = vmul.f32 %v2869_v36, %v3621_v60  ;;  %v2704_v5 = vmul.f32 %v2869_v36, %v3623_v1 }
 0xf86   :  { %v2553_v6 = vadd.f32 1.0, %v2551_v41  ;;  %v2550_v63 = vmul.f32 0.3275911, %v2548_v25  ;;  %v2608_v42 = vpop.permute.xlu1 %2607  ;;  %3207 = vmatpush3.msra.mxu1 %v2610_v61  ;;  %v2576_v46 = vsub.f32 0.0, %v2548_v25  ;;  %v2579_v47 = vmul.f32 %v2577_v45, %v2549_v22  ;;  %3221 = vmatprep.subr.mxu0 %v2707_v32  ;;  %v2870_v61 = vld [vmem:[#allocation4 + $0x178] ss:$0 sm:$0xff] }
 0xf87   :  { %3208 = vmatprep.subr.mxu1 %v2608_v42  ;;  %3222 = vmatpush3.msra.mxu0 %v2707_v32 }
 0xf88   :  { %3289 = vrcp.f32 %v2553_v6  ;;  %v2552_v43 = vadd.f32 1.0, %v2550_v63  ;;  %3209 = vmatpush3.msra.mxu1 %v2608_v42  ;;  %v2606_v44 = vpop.permute.xlu0 %2605  ;;  %v2578_v49 = vmul.f32 %v2576_v46, %v2548_v25  ;;  %v2582_v51 = vmul.f32 1.442695, %v2579_v47 }
 0xf89   :  { %3210 = vmatprep.subr.mxu1 %v2606_v44 }
 0xf8a   :  { %3211 = vmatpush3.msra.mxu1 %v2606_v44  ;;  %3291 = vrcp.f32 %v2552_v43  ;;  %v2580_v33 = vmul.f32 1.442695, %v2578_v49 }
 0xf8b   :  { %3293 = vpow2.f32 %v2582_v51 }
 0xf8c   :  { %3295 = vpow2.f32 %v2580_v33 }
 0xf95   :  { %v3290_v48 = vpop.eup %3289 }
 0xf96   :  { %v2559_v50 = vmul.f32 1.0614054, %v3290_v48 }
 0xf97   :  { %v3292_v54 = vpop.eup %3291 }
 0xf98   :  { %v2561_v55 = vadd.f32 -1.4531521, %v2559_v50  ;;  %v2558_v57 = vmul.f32 1.0614054, %v3292_v54  ;;  %v3294_v29 = vpop.eup %3293 }
 0xf99   :  { %v3296_v14 = vpop.eup %3295 }
 0xf9a   :  { %v2563_v58 = vmul.f32 %v3290_v48, %v2561_v55  ;;  %v2560_v59 = vadd.f32 -1.4531521, %v2558_v57 }
 0xf9c   :  { %v2565_v2 = vadd.f32 1.4214138, %v2563_v58  ;;  %v2562_v24 = vmul.f32 %v3292_v54, %v2560_v59 }
 0xf9e   :  { %v2567_v26 = vmul.f32 %v3290_v48, %v2565_v2  ;;  %v2564_v3 = vadd.f32 1.4214138, %v2562_v24 }
 0xfa0   :  { %v2569_v56 = vadd.f32 -0.28449672, %v2567_v26  ;;  %v2566_v4 = vmul.f32 %v3292_v54, %v2564_v3 }
 0xfa2   :  { %v2571_v62 = vmul.f32 %v3290_v48, %v2569_v56  ;;  %v2568_v28 = vadd.f32 -0.28449672, %v2566_v4 }
 0xfa4   :  { %v2573_v30 = vadd.f32 0.2548296, %v2571_v62  ;;  %v2570_v7 = vmul.f32 %v3292_v54, %v2568_v28 }
 0xfa6   :  { %v2575_v39 = vmul.f32 %v3290_v48, %v2573_v30  ;;  %v2572_v9 = vadd.f32 0.2548296, %v2570_v7 }
 0xfa8   :  { %v2585_v10 = vmul.f32 %v3294_v29, %v2575_v39  ;;  %v2574_v11 = vmul.f32 %v3292_v54, %v2572_v9 }
 0xfaa   :  { %v2587_v53 = vsub.f32 1.0, %v2585_v10  ;;  %v2584_v15 = vmul.f32 %v3296_v14, %v2574_v11 }
 0xfac   :  { %v2591_v17 = vsub.f32 0.0, %v2587_v53  ;;  %v2586_v20 = vsub.f32 1.0, %v2584_v15 }
 0xfae   :  { %v2593_v52 = vsel %vm2589_vm14, %v2591_v17, %v2587_v53  ;;  %v2590_v16 = vsub.f32 0.0, %v2586_v20 }
 0xfaf   :  { %v2597_v18 = vadd.f32 1.0, %v2593_v52 }
 0xfb0   :  { %v2592_v19 = vsel %vm2588_vm15, %v2590_v16, %v2586_v20 }
 0xfb1   :  { %v2596_v27 = vadd.f32 1.0, %v2592_v19  ;;  %v2599_v0 = vmul.f32 %v2597_v18, %v2595_v12 }
 0xfb3   :  { %v2598_v8 = vmul.f32 %v2596_v27, %v2594_v21 }
 0xfb5   :  { %3212 = vmatprep.mubr.msk.f32.mxu1 %vm244_vm5, %v2598_v8 }
 0xfb6   :  { %3213 = vmatmul.mubr.msk.f32.vlgmr.msra.gmra.mxu1 %vm244_vm5, %v2599_v0 }
0x1076   :  { %v3214_v35 = vpop.f32.mrf.mxu1 }
0x1077   :  { %v2695_v37 = vadd.f32 %v3214_v35, %v2866_v34 }
0x1078   :  { %v2689_v38 = vpop.f32.mrf.mxu1 }
0x1079   :  { %v2690_v22 = vadd.f32 %v2866_v34, %v2689_v38  ;;  %v2706_v25 = vadd.f32 %v2704_v5, %v2695_v37 }
0x107b   :  { %v2705_v41 = vadd.f32 %v2703_v40, %v2690_v22 }
0x107d   :  { %3223 = vmatprep.mubr.msk.f32.mxu0 %vm244_vm5, %v2705_v41 }
0x107e   :  { %3224 = vmatmul.mubr.msk.f32.vlgmr.msra.gmra.mxu0 %vm244_vm5, %v2706_v25 }
0x113e   :  { %v3225_v6 = vpop.f32.mrf.mxu0 }
0x113f   :  { %v2794_v63 = vadd.f32 %v3225_v6, %v2870_v61 }
0x1140   :  { %v2788_v42 = vpop.f32.mrf.mxu0 }
0x1141   :  { %2799 = vst.msk [vmem:[%s3784_s5 + $0x8] sm:$0xff] %vm2797_vm0, %v2794_v63  ;;  %v2789_v43 = vadd.f32 %v2870_v61, %v2788_v42 }
0x1143   :  { %2798 = vst.msk [vmem:[%s3784_s5] sm:$0xff] %vm2797_vm0, %v2789_v43 }
0x1144   :  { %2804 = vsyncpa [#allocation3], 1 }
0x1145   :  { %2805 = vsyncpa [#allocation5], 1 }

</bundles_post_ra>
